<compile_context>
chip_gen: v7x
topology: tpu7x:2x2x1
jax: 0.10.0
libtpu: 0.0.40
codegen_flags: <defaults>
</compile_context>

<pallas_src>
import jax
import jax.numpy as jnp
from jax.experimental import pallas as pl
from jax.experimental.pallas import tpu as pltpu


_PRE_CHUNK_T = 16  # timesteps per hoisted input-projection chunk (caps `pre` VMEM)


# ----------------------------------------------------------------------------
# helpers
# ----------------------------------------------------------------------------
def _round_up(x, m):
    return ((x + m - 1) // m) * m


def _full_spec(shape):
    """Whole-array block (block dims == array dims, (8,128) rule trivially met)."""
    ndim = len(shape)
    return pl.BlockSpec(tuple(shape), lambda *_: (0,) * ndim)


def _pad_gate_cols(w, H, G):
    """(rows, 4H) -> (rows, 4G): each gate's H columns zero-padded to G."""
    if G == H:
        return w
    parts = jnp.split(w, 4, axis=1)
    parts = [jnp.pad(p, ((0, 0), (0, G - H))) for p in parts]
    return jnp.concatenate(parts, axis=1)


# ----------------------------------------------------------------------------
# Fused Pallas kernel: all LSTM layers + Linear head in one invocation
# ----------------------------------------------------------------------------
def _make_fused_lstm_kernel(num_layers, L, Bp, Gs, pred_len, chunk_t):
    chunks = [(s, min(chunk_t, L - s)) for s in range(0, L, chunk_t)]
    n_act = 1 if num_layers == 1 else 2

    def kernel(*refs):
        # refs = [x, (wih, whh, b)*num_layers, h0, c0, lin_w, lin_b | out | act..., pre]
        x_ref = refs[0]
        layer_refs = refs[1:1 + 3 * num_layers]
        h0_ref, c0_ref, lw_ref, lb_ref = refs[1 + 3 * num_layers:5 + 3 * num_layers]
        out_ref = refs[5 + 3 * num_layers]
        act_bufs = refs[6 + 3 * num_layers:6 + 3 * num_layers + n_act]
        pre_ref = refs[6 + 3 * num_layers + n_act]

        for layer in range(num_layers):
            wih = layer_refs[3 * layer + 0][...]       # bf16 (in_l, 4*Gs)
            whh = layer_refs[3 * layer + 1][...]       # bf16 (Gs,  4*Gs)
            bias = layer_refs[3 * layer + 2][...]      # f32  (1,   4*Gs)
            out_buf = act_bufs[layer % n_act]
            in_buf = None if layer == 0 else act_bufs[(layer - 1) % n_act]

            h = h0_ref[layer]                          # (Bp, Gs) f32
            c = c0_ref[layer]                          # (Bp, Gs) f32

            for (t0, tc) in chunks:                    # static chunk loop
                rows = tc * Bp
                r0 = t0 * Bp
                if layer == 0:
                    src = x_ref[pl.ds(r0, rows), :]
                else:
                    src = in_buf[pl.ds(r0, rows), :]
                # Hoisted input projection for `tc` timesteps: one MXU matmul,
                # bf16 feed, f32 accumulation, written to VMEM scratch.
                pre_ref[pl.ds(0, rows), :] = (
                    jnp.dot(src.astype(jnp.bfloat16), wih,
                            preferred_element_type=jnp.float32)
                    + bias)

                def step(t, carry, _r0=r0, _whh=whh, _out_buf=out_buf):
                    h, c = carry
                    poff = pl.multiple_of(t * Bp, 8)
                    gates = pre_ref[pl.ds(poff, Bp), :] + jnp.dot(
                        h.astype(jnp.bfloat16), _whh,
                        preferred_element_type=jnp.float32)      # (Bp, 4*Gs) f32
                    i_g = jax.nn.sigmoid(gates[:, 0 * Gs:1 * Gs])
                    f_g = jax.nn.sigmoid(gates[:, 1 * Gs:2 * Gs])
                    g_g = jnp.tanh(gates[:, 2 * Gs:3 * Gs])
                    o_g = jax.nn.sigmoid(gates[:, 3 * Gs:4 * Gs])
                    c = f_g * c + i_g * g_g
                    h = o_g * jnp.tanh(c)
                    ooff = pl.multiple_of(_r0 + t * Bp, 8)
                    _out_buf[pl.ds(ooff, Bp), :] = h             # bounded live range
                    return h, c

                h, c = jax.lax.fori_loop(0, tc, step, (h, c), unroll=min(tc, 8))

        # Linear head: only the last pred_len timesteps; lane-dense Cp output.
        final_buf = act_bufs[(num_layers - 1) % n_act]
        tail = final_buf[pl.ds((L - pred_len) * Bp, pred_len * Bp), :]
        out_ref[...] = (
            jnp.dot(tail.astype(jnp.bfloat16), lw_ref[...],
                    preferred_element_type=jnp.float32)
            + lb_ref[...])

    return kernel


# ----------------------------------------------------------------------------
# Model: mirrors MultiPatch_super/models/LSTM.py forward
# ----------------------------------------------------------------------------
class ModelPallas:
    def __init__(self, configs, key):
        self.input_size = configs["enc_in"]
        self.pred_len = configs["pred_len"]
        self.hidden_size = configs["d_model"]
        self.num_layers = configs["e_layers"]
        self.output_size = configs["c_out"]

        H = self.hidden_size
        # Gate/state width used inside the kernel:
        #  - H < 128 or H % 128 == 0: keep natural width (no per-gate padding)
        #  - otherwise: pad each gate to a 128-lane boundary.
        if H < 128 or H % 128 == 0:
            self.Gs = H
        else:
            self.Gs = _round_up(H, 128)
        self.Cp = _round_up(self.output_size, 128)
        Gs, Cp = self.Gs, self.Cp

        k = 1.0 / (H ** 0.5)
        keys = jax.random.split(key, 4 * self.num_layers + 2)

        self.raw_params = []      # bf16-dequantized torch-layout params (reference)
        self.layer_params = []    # kernel-ready padded params (weights in bf16)
        for layer in range(self.num_layers):
            in_sz = self.input_size if layer == 0 else H
            k0, k1, k2, k3 = keys[4 * layer:4 * layer + 4]
            w_ih = jax.random.uniform(k0, (4 * H, in_sz), jnp.float32, -k, k)
            w_hh = jax.random.uniform(k1, (4 * H, H), jnp.float32, -k, k)
            b_ih = jax.random.uniform(k2, (4 * H,), jnp.float32, -k, k)
            b_hh = jax.random.uniform(k3, (4 * H,), jnp.float32, -k, k)
            b_sum = b_ih + b_hh

            # Weights are stored bf16 for the kernel (review item); the reference
            # compares against the same (dequantized) values, biases stay f32.
            w_ih_q = w_ih.astype(jnp.bfloat16).astype(jnp.float32)
            w_hh_q = w_hh.astype(jnp.bfloat16).astype(jnp.float32)
            self.raw_params.append((w_ih_q, w_hh_q, b_sum))

            wih_t = w_ih_q.T                                   # (in_sz, 4H)
            if layer > 0 and Gs > H:                           # input is padded h
                wih_t = jnp.pad(wih_t, ((0, Gs - H), (0, 0)))
            wih_k = _pad_gate_cols(wih_t, H, Gs).astype(jnp.bfloat16)
            whh_t = w_hh_q.T                                   # (H, 4H)
            if Gs > H:
                whh_t = jnp.pad(whh_t, ((0, Gs - H), (0, 0)))
            whh_k = _pad_gate_cols(whh_t, H, Gs).astype(jnp.bfloat16)
            b_k = _pad_gate_cols(b_sum.reshape(1, 4 * H), H, Gs)      # f32
            self.layer_params.append((wih_k, whh_k, b_k))

        kw, kb = keys[-2], keys[-1]
        lin_w = jax.random.uniform(kw, (self.output_size, H), jnp.float32, -k, k)
        lin_b = jax.random.uniform(kb, (self.output_size,), jnp.float32, -k, k)
        lin_w_q = lin_w.astype(jnp.bfloat16).astype(jnp.float32)
        self.lin_w_raw = lin_w_q
        self.lin_b_raw = lin_b
        self.lin_w_k = jnp.pad(
            lin_w_q.T, ((0, Gs - H), (0, Cp - self.output_size))).astype(jnp.bfloat16)
        self.lin_b_k = jnp.pad(
            lin_b.reshape(1, -1), ((0, 0), (0, Cp - self.output_size)))   # f32

        self._fwd_jit = jax.jit(self._forward_impl)

    # -- jitted forward: layout plumbing + the single fused pallas_call --------
    def _forward_impl(self, input_seq, key):
        B, L, I = input_seq.shape
        H, Gs, Cp = self.hidden_size, self.Gs, self.Cp
        Bp = _round_up(B, 8)                     # sublane-aligned batch rows
        pred_len = self.pred_len

        # torch forward draws fresh randn initial states each call; reproduced
        # deterministically from the supplied key, then padded (Bp, Gs).
        kh, kc = jax.random.split(key)
        h0 = jax.random.normal(kh, (self.num_layers, B, H), jnp.float32)
        c0 = jax.random.normal(kc, (self.num_layers, B, H), jnp.float32)
        h0p = jnp.pad(h0, ((0, 0), (0, Bp - B), (0, Gs - H)))
        c0p = jnp.pad(c0, ((0, 0), (0, Bp - B), (0, Gs - H)))

        # time-major flattened rows: row = t*Bp + b  (padded rows are zeros)
        x_tm = jnp.transpose(input_seq.astype(jnp.float32), (1, 0, 2))    # (L,B,I)
        x_tm = jnp.pad(x_tm, ((0, 0), (0, Bp - B), (0, 0)))               # (L,Bp,I)
        x_flat = x_tm.reshape(L * Bp, I)

        inputs = [x_flat]
        for (wih_k, whh_k, b_k) in self.layer_params:
            inputs += [wih_k, whh_k, b_k]
        inputs += [h0p, c0p, self.lin_w_k, self.lin_b_k]

        chunk_t = min(L, _PRE_CHUNK_T)
        kernel = _make_fused_lstm_kernel(self.num_layers, L, Bp, Gs,
                                         pred_len, chunk_t)

        n_act = 1 if self.num_layers == 1 else 2
        scratch = [pltpu.VMEM((L * Bp, Gs), jnp.float32) for _ in range(n_act)]
        scratch.append(pltpu.VMEM((chunk_t * Bp, 4 * Gs), jnp.float32))   # `pre`

        out2d = pl.pallas_call(
            kernel,
            out_shape=jax.ShapeDtypeStruct((pred_len * Bp, Cp), jnp.float32),
            grid=(),                                   # single fused invocation
            in_specs=[_full_spec(a.shape) for a in inputs],
            out_specs=_full_spec((pred_len * Bp, Cp)),
            scratch_shapes=scratch,
            compiler_params=pltpu.CompilerParams(
                vmem_limit_bytes=64 * 1024 * 1024),
        )(*inputs)

        pred = out2d.reshape(pred_len, Bp, Cp)
        pred = jnp.transpose(pred, (1, 0, 2))[:B, :, :self.output_size]
        return pred

    def forward(self, input_seq, key):
        if self.pred_len > input_seq.shape[1]:
            raise ValueError(
                f"pred_len ({self.pred_len}) > seq_len ({input_seq.shape[1]})")
        return self._fwd_jit(input_seq, key)


# ----------------------------------------------------------------------------
# Pure-JAX reference (torch.nn.LSTM semantics, same bf16-quantized weights)
# ----------------------------------------------------------------------------
def _reference_forward(model, input_seq, key):
    B, L, _ = input_seq.shape
    H = model.hidden_size
    kh, kc = jax.random.split(key)
    h_all = jax.random.normal(kh, (model.num_layers, B, H), jnp.float32)
    c_all = jax.random.normal(kc, (model.num_layers, B, H), jnp.float32)

    x = jnp.transpose(input_seq, (1, 0, 2)).astype(jnp.float32)   # (L, B, I)
    for layer in range(model.num_layers):
        w_ih, w_hh, b = model.raw_params[layer]
        h, c = h_all[layer], c_all[layer]
        hs = []
        for t in range(L):
            gates = x[t] @ w_ih.T + h @ w_hh.T + b
            i_g = jax.nn.sigmoid(gates[:, 0 * H:1 * H])
            f_g = jax.nn.sigmoid(gates[:, 1 * H:2 * H])
            g_g = jnp.tanh(gates[:, 2 * H:3 * H])
            o_g = jax.nn.sigmoid(gates[:, 3 * H:4 * H])
            c = f_g * c + i_g * g_g
            h = o_g * jnp.tanh(c)
            hs.append(h)
        x = jnp.stack(hs, axis=0)
    out = jnp.transpose(x, (1, 0, 2))                              # (B, L, H)
    pred = out @ model.lin_w_raw.T + model.lin_b_raw
    return pred[:, -model.pred_len:, :]


# ----------------------------------------------------------------------------
if __name__ == "__main__":
    configs = dict(enc_in=4, pred_len=4, d_model=32, e_layers=2, c_out=4,
                   batch_size=2)
    B, L = 2, 8

    root = jax.random.PRNGKey(0)
    k_params, k_x, k_state = jax.random.split(root, 3)

    model = ModelPallas(configs, k_params)
    x = jax.random.normal(k_x, (B, L, configs["enc_in"]), jnp.float32)

    pred = jax.block_until_ready(model.forward(x, k_state))
    assert pred.shape == (B, configs["pred_len"], configs["c_out"]), pred.shape
    assert bool(jnp.all(jnp.isfinite(pred)))

    with jax.default_matmul_precision("float32"):
        ref = jax.block_until_ready(_reference_forward(model, x, k_state))
    max_err = float(jnp.max(jnp.abs(pred - ref)))
    assert jnp.allclose(pred, ref, rtol=3e-2, atol=3e-2), max_err

    print("KERNEL_OK")
</pallas_src>

<mosaic_0001>
module attributes {stable_mosaic.version = 11 : i64} {
  func.func @kernel(%arg0: memref<64x4xf32, #tpu.memory_space<vmem>>, %arg1: memref<4x128xbf16, #tpu.memory_space<vmem>>, %arg2: memref<32x128xbf16, #tpu.memory_space<vmem>>, %arg3: memref<1x128xf32, #tpu.memory_space<vmem>>, %arg4: memref<32x128xbf16, #tpu.memory_space<vmem>>, %arg5: memref<32x128xbf16, #tpu.memory_space<vmem>>, %arg6: memref<1x128xf32, #tpu.memory_space<vmem>>, %arg7: memref<2x8x32xf32, #tpu.memory_space<vmem>>, %arg8: memref<2x8x32xf32, #tpu.memory_space<vmem>>, %arg9: memref<32x128xbf16, #tpu.memory_space<vmem>>, %arg10: memref<1x128xf32, #tpu.memory_space<vmem>>, %arg11: memref<32x128xf32, #tpu.memory_space<vmem>>, %arg12: memref<64x32xf32, #tpu.memory_space<vmem>>, %arg13: memref<64x32xf32, #tpu.memory_space<vmem>>, %arg14: memref<64x128xf32, #tpu.memory_space<vmem>>) attributes {dimension_semantics = [], scalar_prefetch = 0 : i64, scratch_operands = 3 : i64, tpu.core_type = #tpu.core_type<tc>} {
    %c0 = arith.constant 0 : index
    %c0_0 = arith.constant 0 : index
    %0 = vector.load %arg1[%c0, %c0_0] : memref<4x128xbf16, #tpu.memory_space<vmem>>, vector<4x128xbf16>
    %c0_1 = arith.constant 0 : index
    %c0_2 = arith.constant 0 : index
    %1 = vector.load %arg2[%c0_1, %c0_2] : memref<32x128xbf16, #tpu.memory_space<vmem>>, vector<32x128xbf16>
    %c0_3 = arith.constant 0 : index
    %c0_4 = arith.constant 0 : index
    %2 = vector.load %arg3[%c0_3, %c0_4] : memref<1x128xf32, #tpu.memory_space<vmem>>, vector<1x128xf32>
    %c0_5 = arith.constant 0 : index
    %c0_6 = arith.constant 0 : index
    %c0_7 = arith.constant 0 : index
    %3 = vector.load %arg7[%c0_5, %c0_6, %c0_7] : memref<2x8x32xf32, #tpu.memory_space<vmem>>, vector<1x8x32xf32>
    %4 = vector.shape_cast %3 : vector<1x8x32xf32> to vector<8x32xf32>
    %c0_8 = arith.constant 0 : index
    %c0_9 = arith.constant 0 : index
    %c0_10 = arith.constant 0 : index
    %5 = vector.load %arg8[%c0_8, %c0_9, %c0_10] : memref<2x8x32xf32, #tpu.memory_space<vmem>>, vector<1x8x32xf32>
    %6 = vector.shape_cast %5 : vector<1x8x32xf32> to vector<8x32xf32>
    %c0_11 = arith.constant 0 : index
    %c0_12 = arith.constant 0 : index
    %7 = vector.load %arg0[%c0_11, %c0_12] : memref<64x4xf32, #tpu.memory_space<vmem>>, vector<64x4xf32>
    %8 = arith.truncf %7 : vector<64x4xf32> to vector<64x4xbf16>
    %cst = arith.constant dense<0.000000e+00> : vector<64x128xf32>
    %9 = tpu.matmul %8, %0, %cst {dimension_numbers = #tpu.dot_dimension_numbers<[1], [0], [0], [1], [0, 0, 1, 1], [], []>} : vector<64x4xbf16>, vector<4x128xbf16>, vector<64x128xf32> -> vector<64x128xf32>
    %10 = vector.broadcast %2 : vector<1x128xf32> to vector<64x128xf32>
    %11 = arith.addf %9, %10 : vector<64x128xf32>
    %c0_13 = arith.constant 0 : index
    %c0_14 = arith.constant 0 : index
    %12 = vector.load %arg14[%c0_13, %c0_14] : memref<64x128xf32, #tpu.memory_space<vmem>>, vector<64x128xf32>
    tpu.vector_store %arg14[%c0_13, %c0_14], %11 {strides = array<i32>} : memref<64x128xf32, #tpu.memory_space<vmem>>, vector<64x128xf32>,
    %c0_i32 = arith.constant 0 : i32
    %c8_i32 = arith.constant 8 : i32
    %13 = arith.muli %c0_i32, %c8_i32 : i32
    %14 = tpu.assume_multiple %13, 8 : i32
    %15 = arith.index_cast %14 : i32 to index
    %c0_15 = arith.constant 0 : index
    %16 = vector.load %arg14[%15, %c0_15] : memref<64x128xf32, #tpu.memory_space<vmem>>, vector<8x128xf32>
    %17 = arith.truncf %4 : vector<8x32xf32> to vector<8x32xbf16>
    %cst_16 = arith.constant dense<0.000000e+00> : vector<8x128xf32>
    %18 = tpu.matmul %17, %1, %cst_16 {dimension_numbers = #tpu.dot_dimension_numbers<[1], [0], [0], [1], [0, 0, 1, 1], [], []>} : vector<8x32xbf16>, vector<32x128xbf16>, vector<8x128xf32> -> vector<8x128xf32>
    %19 = arith.addf %16, %18 : vector<8x128xf32>
    %20 = vector.extract_strided_slice %19 {offsets = [0, 0], sizes = [8, 32], strides = [1, 1]} : vector<8x128xf32> to vector<8x32xf32>
    %21 = arith.negf %20 : vector<8x32xf32>
    %22 = math.exp %21 : vector<8x32xf32>
    %cst_17 = arith.constant 1.000000e+00 : f32
    %23 = vector.broadcast %cst_17 : f32 to vector<8x32xf32>
    %24 = arith.addf %23, %22 : vector<8x32xf32>
    %25 = arith.divf %23, %24 : vector<8x32xf32>
    %26 = vector.extract_strided_slice %19 {offsets = [0, 32], sizes = [8, 32], strides = [1, 1]} : vector<8x128xf32> to vector<8x32xf32>
    %27 = arith.negf %26 : vector<8x32xf32>
    %28 = math.exp %27 : vector<8x32xf32>
    %cst_18 = arith.constant 1.000000e+00 : f32
    %29 = vector.broadcast %cst_18 : f32 to vector<8x32xf32>
    %30 = arith.addf %29, %28 : vector<8x32xf32>
    %31 = arith.divf %29, %30 : vector<8x32xf32>
    %32 = vector.extract_strided_slice %19 {offsets = [0, 64], sizes = [8, 32], strides = [1, 1]} : vector<8x128xf32> to vector<8x32xf32>
    %33 = math.tanh %32 : vector<8x32xf32>
    %34 = vector.extract_strided_slice %19 {offsets = [0, 96], sizes = [8, 32], strides = [1, 1]} : vector<8x128xf32> to vector<8x32xf32>
    %35 = arith.negf %34 : vector<8x32xf32>
    %36 = math.exp %35 : vector<8x32xf32>
    %cst_19 = arith.constant 1.000000e+00 : f32
    %37 = vector.broadcast %cst_19 : f32 to vector<8x32xf32>
    %38 = arith.addf %37, %36 : vector<8x32xf32>
    %39 = arith.divf %37, %38 : vector<8x32xf32>
    %40 = arith.mulf %31, %6 : vector<8x32xf32>
    %41 = arith.mulf %25, %33 : vector<8x32xf32>
    %42 = arith.addf %40, %41 : vector<8x32xf32>
    %43 = math.tanh %42 : vector<8x32xf32>
    %44 = arith.mulf %39, %43 : vector<8x32xf32>
    %c8_i32_20 = arith.constant 8 : i32
    %45 = arith.muli %c0_i32, %c8_i32_20 : i32
    %c0_i32_21 = arith.constant 0 : i32
    %46 = arith.addi %c0_i32_21, %45 : i32
    %47 = tpu.assume_multiple %46, 8 : i32
    %48 = arith.index_cast %47 : i32 to index
    %c0_22 = arith.constant 0 : index
    %49 = vector.load %arg12[%48, %c0_22] : memref<64x32xf32, #tpu.memory_space<vmem>>, vector<8x32xf32>
    tpu.vector_store %arg12[%48, %c0_22], %44 {strides = array<i32>} : memref<64x32xf32, #tpu.memory_space<vmem>>, vector<8x32xf32>,
    %c1_i32 = arith.constant 1 : i32
    %c8_i32_23 = arith.constant 8 : i32
    %50 = arith.muli %c1_i32, %c8_i32_23 : i32
    %51 = tpu.assume_multiple %50, 8 : i32
    %52 = arith.index_cast %51 : i32 to index
    %c0_24 = arith.constant 0 : index
    %53 = vector.load %arg14[%52, %c0_24] : memref<64x128xf32, #tpu.memory_space<vmem>>, vector<8x128xf32>
    %54 = arith.truncf %44 : vector<8x32xf32> to vector<8x32xbf16>
    %cst_25 = arith.constant dense<0.000000e+00> : vector<8x128xf32>
    %55 = tpu.matmul %54, %1, %cst_25 {dimension_numbers = #tpu.dot_dimension_numbers<[1], [0], [0], [1], [0, 0, 1, 1], [], []>} : vector<8x32xbf16>, vector<32x128xbf16>, vector<8x128xf32> -> vector<8x128xf32>
    %56 = arith.addf %53, %55 : vector<8x128xf32>
    %57 = vector.extract_strided_slice %56 {offsets = [0, 0], sizes = [8, 32], strides = [1, 1]} : vector<8x128xf32> to vector<8x32xf32>
    %58 = arith.negf %57 : vector<8x32xf32>
    %59 = math.exp %58 : vector<8x32xf32>
    %cst_26 = arith.constant 1.000000e+00 : f32
    %60 = vector.broadcast %cst_26 : f32 to vector<8x32xf32>
    %61 = arith.addf %60, %59 : vector<8x32xf32>
    %62 = arith.divf %60, %61 : vector<8x32xf32>
    %63 = vector.extract_strided_slice %56 {offsets = [0, 32], sizes = [8, 32], strides = [1, 1]} : vector<8x128xf32> to vector<8x32xf32>
    %64 = arith.negf %63 : vector<8x32xf32>
    %65 = math.exp %64 : vector<8x32xf32>
    %cst_27 = arith.constant 1.000000e+00 : f32
    %66 = vector.broadcast %cst_27 : f32 to vector<8x32xf32>
    %67 = arith.addf %66, %65 : vector<8x32xf32>
    %68 = arith.divf %66, %67 : vector<8x32xf32>
    %69 = vector.extract_strided_slice %56 {offsets = [0, 64], sizes = [8, 32], strides = [1, 1]} : vector<8x128xf32> to vector<8x32xf32>
    %70 = math.tanh %69 : vector<8x32xf32>
    %71 = vector.extract_strided_slice %56 {offsets = [0, 96], sizes = [8, 32], strides = [1, 1]} : vector<8x128xf32> to vector<8x32xf32>
    %72 = arith.negf %71 : vector<8x32xf32>
    %73 = math.exp %72 : vector<8x32xf32>
    %cst_28 = arith.constant 1.000000e+00 : f32
    %74 = vector.broadcast %cst_28 : f32 to vector<8x32xf32>
    %75 = arith.addf %74, %73 : vector<8x32xf32>
    %76 = arith.divf %74, %75 : vector<8x32xf32>
    %77 = arith.mulf %68, %42 : vector<8x32xf32>
    %78 = arith.mulf %62, %70 : vector<8x32xf32>
    %79 = arith.addf %77, %78 : vector<8x32xf32>
    %80 = math.tanh %79 : vector<8x32xf32>
    %81 = arith.mulf %76, %80 : vector<8x32xf32>
    %c8_i32_29 = arith.constant 8 : i32
    %82 = arith.muli %c1_i32, %c8_i32_29 : i32
    %c0_i32_30 = arith.constant 0 : i32
    %83 = arith.addi %c0_i32_30, %82 : i32
    %84 = tpu.assume_multiple %83, 8 : i32
    %85 = arith.index_cast %84 : i32 to index
    %c0_31 = arith.constant 0 : index
    %86 = vector.load %arg12[%85, %c0_31] : memref<64x32xf32, #tpu.memory_space<vmem>>, vector<8x32xf32>
    tpu.vector_store %arg12[%85, %c0_31], %81 {strides = array<i32>} : memref<64x32xf32, #tpu.memory_space<vmem>>, vector<8x32xf32>,
    %c2_i32 = arith.constant 2 : i32
    %c8_i32_32 = arith.constant 8 : i32
    %87 = arith.muli %c2_i32, %c8_i32_32 : i32
    %88 = tpu.assume_multiple %87, 8 : i32
    %89 = arith.index_cast %88 : i32 to index
    %c0_33 = arith.constant 0 : index
    %90 = vector.load %arg14[%89, %c0_33] : memref<64x128xf32, #tpu.memory_space<vmem>>, vector<8x128xf32>
    %91 = arith.truncf %81 : vector<8x32xf32> to vector<8x32xbf16>
    %cst_34 = arith.constant dense<0.000000e+00> : vector<8x128xf32>
    %92 = tpu.matmul %91, %1, %cst_34 {dimension_numbers = #tpu.dot_dimension_numbers<[1], [0], [0], [1], [0, 0, 1, 1], [], []>} : vector<8x32xbf16>, vector<32x128xbf16>, vector<8x128xf32> -> vector<8x128xf32>
    %93 = arith.addf %90, %92 : vector<8x128xf32>
    %94 = vector.extract_strided_slice %93 {offsets = [0, 0], sizes = [8, 32], strides = [1, 1]} : vector<8x128xf32> to vector<8x32xf32>
    %95 = arith.negf %94 : vector<8x32xf32>
    %96 = math.exp %95 : vector<8x32xf32>
    %cst_35 = arith.constant 1.000000e+00 : f32
    %97 = vector.broadcast %cst_35 : f32 to vector<8x32xf32>
    %98 = arith.addf %97, %96 : vector<8x32xf32>
    %99 = arith.divf %97, %98 : vector<8x32xf32>
    %100 = vector.extract_strided_slice %93 {offsets = [0, 32], sizes = [8, 32], strides = [1, 1]} : vector<8x128xf32> to vector<8x32xf32>
    %101 = arith.negf %100 : vector<8x32xf32>
    %102 = math.exp %101 : vector<8x32xf32>
    %cst_36 = arith.constant 1.000000e+00 : f32
    %103 = vector.broadcast %cst_36 : f32 to vector<8x32xf32>
    %104 = arith.addf %103, %102 : vector<8x32xf32>
    %105 = arith.divf %103, %104 : vector<8x32xf32>
    %106 = vector.extract_strided_slice %93 {offsets = [0, 64], sizes = [8, 32], strides = [1, 1]} : vector<8x128xf32> to vector<8x32xf32>
    %107 = math.tanh %106 : vector<8x32xf32>
    %108 = vector.extract_strided_slice %93 {offsets = [0, 96], sizes = [8, 32], strides = [1, 1]} : vector<8x128xf32> to vector<8x32xf32>
    %109 = arith.negf %108 : vector<8x32xf32>
    %110 = math.exp %109 : vector<8x32xf32>
    %cst_37 = arith.constant 1.000000e+00 : f32
    %111 = vector.broadcast %cst_37 : f32 to vector<8x32xf32>
    %112 = arith.addf %111, %110 : vector<8x32xf32>
    %113 = arith.divf %111, %112 : vector<8x32xf32>
    %114 = arith.mulf %105, %79 : vector<8x32xf32>
    %115 = arith.mulf %99, %107 : vector<8x32xf32>
    %116 = arith.addf %114, %115 : vector<8x32xf32>
    %117 = math.tanh %116 : vector<8x32xf32>
    %118 = arith.mulf %113, %117 : vector<8x32xf32>
    %c8_i32_38 = arith.constant 8 : i32
    %119 = arith.muli %c2_i32, %c8_i32_38 : i32
    %c0_i32_39 = arith.constant 0 : i32
    %120 = arith.addi %c0_i32_39, %119 : i32
    %121 = tpu.assume_multiple %120, 8 : i32
    %122 = arith.index_cast %121 : i32 to index
    %c0_40 = arith.constant 0 : index
    %123 = vector.load %arg12[%122, %c0_40] : memref<64x32xf32, #tpu.memory_space<vmem>>, vector<8x32xf32>
    tpu.vector_store %arg12[%122, %c0_40], %118 {strides = array<i32>} : memref<64x32xf32, #tpu.memory_space<vmem>>, vector<8x32xf32>,
    %c3_i32 = arith.constant 3 : i32
    %c8_i32_41 = arith.constant 8 : i32
    %124 = arith.muli %c3_i32, %c8_i32_41 : i32
    %125 = tpu.assume_multiple %124, 8 : i32
    %126 = arith.index_cast %125 : i32 to index
    %c0_42 = arith.constant 0 : index
    %127 = vector.load %arg14[%126, %c0_42] : memref<64x128xf32, #tpu.memory_space<vmem>>, vector<8x128xf32>
    %128 = arith.truncf %118 : vector<8x32xf32> to vector<8x32xbf16>
    %cst_43 = arith.constant dense<0.000000e+00> : vector<8x128xf32>
    %129 = tpu.matmul %128, %1, %cst_43 {dimension_numbers = #tpu.dot_dimension_numbers<[1], [0], [0], [1], [0, 0, 1, 1], [], []>} : vector<8x32xbf16>, vector<32x128xbf16>, vector<8x128xf32> -> vector<8x128xf32>
    %130 = arith.addf %127, %129 : vector<8x128xf32>
    %131 = vector.extract_strided_slice %130 {offsets = [0, 0], sizes = [8, 32], strides = [1, 1]} : vector<8x128xf32> to vector<8x32xf32>
    %132 = arith.negf %131 : vector<8x32xf32>
    %133 = math.exp %132 : vector<8x32xf32>
    %cst_44 = arith.constant 1.000000e+00 : f32
    %134 = vector.broadcast %cst_44 : f32 to vector<8x32xf32>
    %135 = arith.addf %134, %133 : vector<8x32xf32>
    %136 = arith.divf %134, %135 : vector<8x32xf32>
    %137 = vector.extract_strided_slice %130 {offsets = [0, 32], sizes = [8, 32], strides = [1, 1]} : vector<8x128xf32> to vector<8x32xf32>
    %138 = arith.negf %137 : vector<8x32xf32>
    %139 = math.exp %138 : vector<8x32xf32>
    %cst_45 = arith.constant 1.000000e+00 : f32
    %140 = vector.broadcast %cst_45 : f32 to vector<8x32xf32>
    %141 = arith.addf %140, %139 : vector<8x32xf32>
    %142 = arith.divf %140, %141 : vector<8x32xf32>
    %143 = vector.extract_strided_slice %130 {offsets = [0, 64], sizes = [8, 32], strides = [1, 1]} : vector<8x128xf32> to vector<8x32xf32>
    %144 = math.tanh %143 : vector<8x32xf32>
    %145 = vector.extract_strided_slice %130 {offsets = [0, 96], sizes = [8, 32], strides = [1, 1]} : vector<8x128xf32> to vector<8x32xf32>
    %146 = arith.negf %145 : vector<8x32xf32>
    %147 = math.exp %146 : vector<8x32xf32>
    %cst_46 = arith.constant 1.000000e+00 : f32
    %148 = vector.broadcast %cst_46 : f32 to vector<8x32xf32>
    %149 = arith.addf %148, %147 : vector<8x32xf32>
    %150 = arith.divf %148, %149 : vector<8x32xf32>
    %151 = arith.mulf %142, %116 : vector<8x32xf32>
    %152 = arith.mulf %136, %144 : vector<8x32xf32>
    %153 = arith.addf %151, %152 : vector<8x32xf32>
    %154 = math.tanh %153 : vector<8x32xf32>
    %155 = arith.mulf %150, %154 : vector<8x32xf32>
    %c8_i32_47 = arith.constant 8 : i32
    %156 = arith.muli %c3_i32, %c8_i32_47 : i32
    %c0_i32_48 = arith.constant 0 : i32
    %157 = arith.addi %c0_i32_48, %156 : i32
    %158 = tpu.assume_multiple %157, 8 : i32
    %159 = arith.index_cast %158 : i32 to index
    %c0_49 = arith.constant 0 : index
    %160 = vector.load %arg12[%159, %c0_49] : memref<64x32xf32, #tpu.memory_space<vmem>>, vector<8x32xf32>
    tpu.vector_store %arg12[%159, %c0_49], %155 {strides = array<i32>} : memref<64x32xf32, #tpu.memory_space<vmem>>, vector<8x32xf32>,
    %c4_i32 = arith.constant 4 : i32
    %c8_i32_50 = arith.constant 8 : i32
    %161 = arith.muli %c4_i32, %c8_i32_50 : i32
    %162 = tpu.assume_multiple %161, 8 : i32
    %163 = arith.index_cast %162 : i32 to index
    %c0_51 = arith.constant 0 : index
    %164 = vector.load %arg14[%163, %c0_51] : memref<64x128xf32, #tpu.memory_space<vmem>>, vector<8x128xf32>
    %165 = arith.truncf %155 : vector<8x32xf32> to vector<8x32xbf16>
    %cst_52 = arith.constant dense<0.000000e+00> : vector<8x128xf32>
    %166 = tpu.matmul %165, %1, %cst_52 {dimension_numbers = #tpu.dot_dimension_numbers<[1], [0], [0], [1], [0, 0, 1, 1], [], []>} : vector<8x32xbf16>, vector<32x128xbf16>, vector<8x128xf32> -> vector<8x128xf32>
    %167 = arith.addf %164, %166 : vector<8x128xf32>
    %168 = vector.extract_strided_slice %167 {offsets = [0, 0], sizes = [8, 32], strides = [1, 1]} : vector<8x128xf32> to vector<8x32xf32>
    %169 = arith.negf %168 : vector<8x32xf32>
    %170 = math.exp %169 : vector<8x32xf32>
    %cst_53 = arith.constant 1.000000e+00 : f32
    %171 = vector.broadcast %cst_53 : f32 to vector<8x32xf32>
    %172 = arith.addf %171, %170 : vector<8x32xf32>
    %173 = arith.divf %171, %172 : vector<8x32xf32>
    %174 = vector.extract_strided_slice %167 {offsets = [0, 32], sizes = [8, 32], strides = [1, 1]} : vector<8x128xf32> to vector<8x32xf32>
    %175 = arith.negf %174 : vector<8x32xf32>
    %176 = math.exp %175 : vector<8x32xf32>
    %cst_54 = arith.constant 1.000000e+00 : f32
    %177 = vector.broadcast %cst_54 : f32 to vector<8x32xf32>
    %178 = arith.addf %177, %176 : vector<8x32xf32>
    %179 = arith.divf %177, %178 : vector<8x32xf32>
    %180 = vector.extract_strided_slice %167 {offsets = [0, 64], sizes = [8, 32], strides = [1, 1]} : vector<8x128xf32> to vector<8x32xf32>
    %181 = math.tanh %180 : vector<8x32xf32>
    %182 = vector.extract_strided_slice %167 {offsets = [0, 96], sizes = [8, 32], strides = [1, 1]} : vector<8x128xf32> to vector<8x32xf32>
    %183 = arith.negf %182 : vector<8x32xf32>
    %184 = math.exp %183 : vector<8x32xf32>
    %cst_55 = arith.constant 1.000000e+00 : f32
    %185 = vector.broadcast %cst_55 : f32 to vector<8x32xf32>
    %186 = arith.addf %185, %184 : vector<8x32xf32>
    %187 = arith.divf %185, %186 : vector<8x32xf32>
    %188 = arith.mulf %179, %153 : vector<8x32xf32>
    %189 = arith.mulf %173, %181 : vector<8x32xf32>
    %190 = arith.addf %188, %189 : vector<8x32xf32>
    %191 = math.tanh %190 : vector<8x32xf32>
    %192 = arith.mulf %187, %191 : vector<8x32xf32>
    %c8_i32_56 = arith.constant 8 : i32
    %193 = arith.muli %c4_i32, %c8_i32_56 : i32
    %c0_i32_57 = arith.constant 0 : i32
    %194 = arith.addi %c0_i32_57, %193 : i32
    %195 = tpu.assume_multiple %194, 8 : i32
    %196 = arith.index_cast %195 : i32 to index
    %c0_58 = arith.constant 0 : index
    %197 = vector.load %arg12[%196, %c0_58] : memref<64x32xf32, #tpu.memory_space<vmem>>, vector<8x32xf32>
    tpu.vector_store %arg12[%196, %c0_58], %192 {strides = array<i32>} : memref<64x32xf32, #tpu.memory_space<vmem>>, vector<8x32xf32>,
    %c5_i32 = arith.constant 5 : i32
    %c8_i32_59 = arith.constant 8 : i32
    %198 = arith.muli %c5_i32, %c8_i32_59 : i32
    %199 = tpu.assume_multiple %198, 8 : i32
    %200 = arith.index_cast %199 : i32 to index
    %c0_60 = arith.constant 0 : index
    %201 = vector.load %arg14[%200, %c0_60] : memref<64x128xf32, #tpu.memory_space<vmem>>, vector<8x128xf32>
    %202 = arith.truncf %192 : vector<8x32xf32> to vector<8x32xbf16>
    %cst_61 = arith.constant dense<0.000000e+00> : vector<8x128xf32>
    %203 = tpu.matmul %202, %1, %cst_61 {dimension_numbers = #tpu.dot_dimension_numbers<[1], [0], [0], [1], [0, 0, 1, 1], [], []>} : vector<8x32xbf16>, vector<32x128xbf16>, vector<8x128xf32> -> vector<8x128xf32>
    %204 = arith.addf %201, %203 : vector<8x128xf32>
    %205 = vector.extract_strided_slice %204 {offsets = [0, 0], sizes = [8, 32], strides = [1, 1]} : vector<8x128xf32> to vector<8x32xf32>
    %206 = arith.negf %205 : vector<8x32xf32>
    %207 = math.exp %206 : vector<8x32xf32>
    %cst_62 = arith.constant 1.000000e+00 : f32
    %208 = vector.broadcast %cst_62 : f32 to vector<8x32xf32>
    %209 = arith.addf %208, %207 : vector<8x32xf32>
    %210 = arith.divf %208, %209 : vector<8x32xf32>
    %211 = vector.extract_strided_slice %204 {offsets = [0, 32], sizes = [8, 32], strides = [1, 1]} : vector<8x128xf32> to vector<8x32xf32>
    %212 = arith.negf %211 : vector<8x32xf32>
    %213 = math.exp %212 : vector<8x32xf32>
    %cst_63 = arith.constant 1.000000e+00 : f32
    %214 = vector.broadcast %cst_63 : f32 to vector<8x32xf32>
    %215 = arith.addf %214, %213 : vector<8x32xf32>
    %216 = arith.divf %214, %215 : vector<8x32xf32>
    %217 = vector.extract_strided_slice %204 {offsets = [0, 64], sizes = [8, 32], strides = [1, 1]} : vector<8x128xf32> to vector<8x32xf32>
    %218 = math.tanh %217 : vector<8x32xf32>
    %219 = vector.extract_strided_slice %204 {offsets = [0, 96], sizes = [8, 32], strides = [1, 1]} : vector<8x128xf32> to vector<8x32xf32>
    %220 = arith.negf %219 : vector<8x32xf32>
    %221 = math.exp %220 : vector<8x32xf32>
    %cst_64 = arith.constant 1.000000e+00 : f32
    %222 = vector.broadcast %cst_64 : f32 to vector<8x32xf32>
    %223 = arith.addf %222, %221 : vector<8x32xf32>
    %224 = arith.divf %222, %223 : vector<8x32xf32>
    %225 = arith.mulf %216, %190 : vector<8x32xf32>
    %226 = arith.mulf %210, %218 : vector<8x32xf32>
    %227 = arith.addf %225, %226 : vector<8x32xf32>
    %228 = math.tanh %227 : vector<8x32xf32>
    %229 = arith.mulf %224, %228 : vector<8x32xf32>
    %c8_i32_65 = arith.constant 8 : i32
    %230 = arith.muli %c5_i32, %c8_i32_65 : i32
    %c0_i32_66 = arith.constant 0 : i32
    %231 = arith.addi %c0_i32_66, %230 : i32
    %232 = tpu.assume_multiple %231, 8 : i32
    %233 = arith.index_cast %232 : i32 to index
    %c0_67 = arith.constant 0 : index
    %234 = vector.load %arg12[%233, %c0_67] : memref<64x32xf32, #tpu.memory_space<vmem>>, vector<8x32xf32>
    tpu.vector_store %arg12[%233, %c0_67], %229 {strides = array<i32>} : memref<64x32xf32, #tpu.memory_space<vmem>>, vector<8x32xf32>,
    %c6_i32 = arith.constant 6 : i32
    %c8_i32_68 = arith.constant 8 : i32
    %235 = arith.muli %c6_i32, %c8_i32_68 : i32
    %236 = tpu.assume_multiple %235, 8 : i32
    %237 = arith.index_cast %236 : i32 to index
    %c0_69 = arith.constant 0 : index
    %238 = vector.load %arg14[%237, %c0_69] : memref<64x128xf32, #tpu.memory_space<vmem>>, vector<8x128xf32>
    %239 = arith.truncf %229 : vector<8x32xf32> to vector<8x32xbf16>
    %cst_70 = arith.constant dense<0.000000e+00> : vector<8x128xf32>
    %240 = tpu.matmul %239, %1, %cst_70 {dimension_numbers = #tpu.dot_dimension_numbers<[1], [0], [0], [1], [0, 0, 1, 1], [], []>} : vector<8x32xbf16>, vector<32x128xbf16>, vector<8x128xf32> -> vector<8x128xf32>
    %241 = arith.addf %238, %240 : vector<8x128xf32>
    %242 = vector.extract_strided_slice %241 {offsets = [0, 0], sizes = [8, 32], strides = [1, 1]} : vector<8x128xf32> to vector<8x32xf32>
    %243 = arith.negf %242 : vector<8x32xf32>
    %244 = math.exp %243 : vector<8x32xf32>
    %cst_71 = arith.constant 1.000000e+00 : f32
    %245 = vector.broadcast %cst_71 : f32 to vector<8x32xf32>
    %246 = arith.addf %245, %244 : vector<8x32xf32>
    %247 = arith.divf %245, %246 : vector<8x32xf32>
    %248 = vector.extract_strided_slice %241 {offsets = [0, 32], sizes = [8, 32], strides = [1, 1]} : vector<8x128xf32> to vector<8x32xf32>
    %249 = arith.negf %248 : vector<8x32xf32>
    %250 = math.exp %249 : vector<8x32xf32>
    %cst_72 = arith.constant 1.000000e+00 : f32
    %251 = vector.broadcast %cst_72 : f32 to vector<8x32xf32>
    %252 = arith.addf %251, %250 : vector<8x32xf32>
    %253 = arith.divf %251, %252 : vector<8x32xf32>
    %254 = vector.extract_strided_slice %241 {offsets = [0, 64], sizes = [8, 32], strides = [1, 1]} : vector<8x128xf32> to vector<8x32xf32>
    %255 = math.tanh %254 : vector<8x32xf32>
    %256 = vector.extract_strided_slice %241 {offsets = [0, 96], sizes = [8, 32], strides = [1, 1]} : vector<8x128xf32> to vector<8x32xf32>
    %257 = arith.negf %256 : vector<8x32xf32>
    %258 = math.exp %257 : vector<8x32xf32>
    %cst_73 = arith.constant 1.000000e+00 : f32
    %259 = vector.broadcast %cst_73 : f32 to vector<8x32xf32>
    %260 = arith.addf %259, %258 : vector<8x32xf32>
    %261 = arith.divf %259, %260 : vector<8x32xf32>
    %262 = arith.mulf %253, %227 : vector<8x32xf32>
    %263 = arith.mulf %247, %255 : vector<8x32xf32>
    %264 = arith.addf %262, %263 : vector<8x32xf32>
    %265 = math.tanh %264 : vector<8x32xf32>
    %266 = arith.mulf %261, %265 : vector<8x32xf32>
    %c8_i32_74 = arith.constant 8 : i32
    %267 = arith.muli %c6_i32, %c8_i32_74 : i32
    %c0_i32_75 = arith.constant 0 : i32
    %268 = arith.addi %c0_i32_75, %267 : i32
    %269 = tpu.assume_multiple %268, 8 : i32
    %270 = arith.index_cast %269 : i32 to index
    %c0_76 = arith.constant 0 : index
    %271 = vector.load %arg12[%270, %c0_76] : memref<64x32xf32, #tpu.memory_space<vmem>>, vector<8x32xf32>
    tpu.vector_store %arg12[%270, %c0_76], %266 {strides = array<i32>} : memref<64x32xf32, #tpu.memory_space<vmem>>, vector<8x32xf32>,
    %c7_i32 = arith.constant 7 : i32
    %c8_i32_77 = arith.constant 8 : i32
    %272 = arith.muli %c7_i32, %c8_i32_77 : i32
    %273 = tpu.assume_multiple %272, 8 : i32
    %274 = arith.index_cast %273 : i32 to index
    %c0_78 = arith.constant 0 : index
    %275 = vector.load %arg14[%274, %c0_78] : memref<64x128xf32, #tpu.memory_space<vmem>>, vector<8x128xf32>
    %276 = arith.truncf %266 : vector<8x32xf32> to vector<8x32xbf16>
    %cst_79 = arith.constant dense<0.000000e+00> : vector<8x128xf32>
    %277 = tpu.matmul %276, %1, %cst_79 {dimension_numbers = #tpu.dot_dimension_numbers<[1], [0], [0], [1], [0, 0, 1, 1], [], []>} : vector<8x32xbf16>, vector<32x128xbf16>, vector<8x128xf32> -> vector<8x128xf32>
    %278 = arith.addf %275, %277 : vector<8x128xf32>
    %279 = vector.extract_strided_slice %278 {offsets = [0, 0], sizes = [8, 32], strides = [1, 1]} : vector<8x128xf32> to vector<8x32xf32>
    %280 = arith.negf %279 : vector<8x32xf32>
    %281 = math.exp %280 : vector<8x32xf32>
    %cst_80 = arith.constant 1.000000e+00 : f32
    %282 = vector.broadcast %cst_80 : f32 to vector<8x32xf32>
    %283 = arith.addf %282, %281 : vector<8x32xf32>
    %284 = arith.divf %282, %283 : vector<8x32xf32>
    %285 = vector.extract_strided_slice %278 {offsets = [0, 32], sizes = [8, 32], strides = [1, 1]} : vector<8x128xf32> to vector<8x32xf32>
    %286 = arith.negf %285 : vector<8x32xf32>
    %287 = math.exp %286 : vector<8x32xf32>
    %cst_81 = arith.constant 1.000000e+00 : f32
    %288 = vector.broadcast %cst_81 : f32 to vector<8x32xf32>
    %289 = arith.addf %288, %287 : vector<8x32xf32>
    %290 = arith.divf %288, %289 : vector<8x32xf32>
    %291 = vector.extract_strided_slice %278 {offsets = [0, 64], sizes = [8, 32], strides = [1, 1]} : vector<8x128xf32> to vector<8x32xf32>
    %292 = math.tanh %291 : vector<8x32xf32>
    %293 = vector.extract_strided_slice %278 {offsets = [0, 96], sizes = [8, 32], strides = [1, 1]} : vector<8x128xf32> to vector<8x32xf32>
    %294 = arith.negf %293 : vector<8x32xf32>
    %295 = math.exp %294 : vector<8x32xf32>
    %cst_82 = arith.constant 1.000000e+00 : f32
    %296 = vector.broadcast %cst_82 : f32 to vector<8x32xf32>
    %297 = arith.addf %296, %295 : vector<8x32xf32>
    %298 = arith.divf %296, %297 : vector<8x32xf32>
    %299 = arith.mulf %290, %264 : vector<8x32xf32>
    %300 = arith.mulf %284, %292 : vector<8x32xf32>
    %301 = arith.addf %299, %300 : vector<8x32xf32>
    %302 = math.tanh %301 : vector<8x32xf32>
    %303 = arith.mulf %298, %302 : vector<8x32xf32>
    %c8_i32_83 = arith.constant 8 : i32
    %304 = arith.muli %c7_i32, %c8_i32_83 : i32
    %c0_i32_84 = arith.constant 0 : i32
    %305 = arith.addi %c0_i32_84, %304 : i32
    %306 = tpu.assume_multiple %305, 8 : i32
    %307 = arith.index_cast %306 : i32 to index
    %c0_85 = arith.constant 0 : index
    %308 = vector.load %arg12[%307, %c0_85] : memref<64x32xf32, #tpu.memory_space<vmem>>, vector<8x32xf32>
    tpu.vector_store %arg12[%307, %c0_85], %303 {strides = array<i32>} : memref<64x32xf32, #tpu.memory_space<vmem>>, vector<8x32xf32>,
    %c8_i32_86 = arith.constant 8 : i32
    %c0_87 = arith.constant 0 : index
    %c0_88 = arith.constant 0 : index
    %309 = vector.load %arg4[%c0_87, %c0_88] : memref<32x128xbf16, #tpu.memory_space<vmem>>, vector<32x128xbf16>
    %c0_89 = arith.constant 0 : index
    %c0_90 = arith.constant 0 : index
    %310 = vector.load %arg5[%c0_89, %c0_90] : memref<32x128xbf16, #tpu.memory_space<vmem>>, vector<32x128xbf16>
    %c0_91 = arith.constant 0 : index
    %c0_92 = arith.constant 0 : index
    %311 = vector.load %arg6[%c0_91, %c0_92] : memref<1x128xf32, #tpu.memory_space<vmem>>, vector<1x128xf32>
    %c1 = arith.constant 1 : index
    %c0_93 = arith.constant 0 : index
    %c0_94 = arith.constant 0 : index
    %312 = vector.load %arg7[%c1, %c0_93, %c0_94] : memref<2x8x32xf32, #tpu.memory_space<vmem>>, vector<1x8x32xf32>
    %313 = vector.shape_cast %312 : vector<1x8x32xf32> to vector<8x32xf32>
    %c1_95 = arith.constant 1 : index
    %c0_96 = arith.constant 0 : index
    %c0_97 = arith.constant 0 : index
    %314 = vector.load %arg8[%c1_95, %c0_96, %c0_97] : memref<2x8x32xf32, #tpu.memory_space<vmem>>, vector<1x8x32xf32>
    %315 = vector.shape_cast %314 : vector<1x8x32xf32> to vector<8x32xf32>
    %c0_98 = arith.constant 0 : index
    %c0_99 = arith.constant 0 : index
    %316 = vector.load %arg12[%c0_98, %c0_99] : memref<64x32xf32, #tpu.memory_space<vmem>>, vector<64x32xf32>
    %317 = arith.truncf %316 : vector<64x32xf32> to vector<64x32xbf16>
    %cst_100 = arith.constant dense<0.000000e+00> : vector<64x128xf32>
    %318 = tpu.matmul %317, %309, %cst_100 {dimension_numbers = #tpu.dot_dimension_numbers<[1], [0], [0], [1], [0, 0, 1, 1], [], []>} : vector<64x32xbf16>, vector<32x128xbf16>, vector<64x128xf32> -> vector<64x128xf32>
    %319 = vector.broadcast %311 : vector<1x128xf32> to vector<64x128xf32>
    %320 = arith.addf %318, %319 : vector<64x128xf32>
    %c0_101 = arith.constant 0 : index
    %c0_102 = arith.constant 0 : index
    %321 = vector.load %arg14[%c0_101, %c0_102] : memref<64x128xf32, #tpu.memory_space<vmem>>, vector<64x128xf32>
    tpu.vector_store %arg14[%c0_101, %c0_102], %320 {strides = array<i32>} : memref<64x128xf32, #tpu.memory_space<vmem>>, vector<64x128xf32>,
    %c0_i32_103 = arith.constant 0 : i32
    %c8_i32_104 = arith.constant 8 : i32
    %322 = arith.muli %c0_i32_103, %c8_i32_104 : i32
    %323 = tpu.assume_multiple %322, 8 : i32
    %324 = arith.index_cast %323 : i32 to index
    %c0_105 = arith.constant 0 : index
    %325 = vector.load %arg14[%324, %c0_105] : memref<64x128xf32, #tpu.memory_space<vmem>>, vector<8x128xf32>
    %326 = arith.truncf %313 : vector<8x32xf32> to vector<8x32xbf16>
    %cst_106 = arith.constant dense<0.000000e+00> : vector<8x128xf32>
    %327 = tpu.matmul %326, %310, %cst_106 {dimension_numbers = #tpu.dot_dimension_numbers<[1], [0], [0], [1], [0, 0, 1, 1], [], []>} : vector<8x32xbf16>, vector<32x128xbf16>, vector<8x128xf32> -> vector<8x128xf32>
    %328 = arith.addf %325, %327 : vector<8x128xf32>
    %329 = vector.extract_strided_slice %328 {offsets = [0, 0], sizes = [8, 32], strides = [1, 1]} : vector<8x128xf32> to vector<8x32xf32>
    %330 = arith.negf %329 : vector<8x32xf32>
    %331 = math.exp %330 : vector<8x32xf32>
    %cst_107 = arith.constant 1.000000e+00 : f32
    %332 = vector.broadcast %cst_107 : f32 to vector<8x32xf32>
    %333 = arith.addf %332, %331 : vector<8x32xf32>
    %334 = arith.divf %332, %333 : vector<8x32xf32>
    %335 = vector.extract_strided_slice %328 {offsets = [0, 32], sizes = [8, 32], strides = [1, 1]} : vector<8x128xf32> to vector<8x32xf32>
    %336 = arith.negf %335 : vector<8x32xf32>
    %337 = math.exp %336 : vector<8x32xf32>
    %cst_108 = arith.constant 1.000000e+00 : f32
    %338 = vector.broadcast %cst_108 : f32 to vector<8x32xf32>
    %339 = arith.addf %338, %337 : vector<8x32xf32>
    %340 = arith.divf %338, %339 : vector<8x32xf32>
    %341 = vector.extract_strided_slice %328 {offsets = [0, 64], sizes = [8, 32], strides = [1, 1]} : vector<8x128xf32> to vector<8x32xf32>
    %342 = math.tanh %341 : vector<8x32xf32>
    %343 = vector.extract_strided_slice %328 {offsets = [0, 96], sizes = [8, 32], strides = [1, 1]} : vector<8x128xf32> to vector<8x32xf32>
    %344 = arith.negf %343 : vector<8x32xf32>
    %345 = math.exp %344 : vector<8x32xf32>
    %cst_109 = arith.constant 1.000000e+00 : f32
    %346 = vector.broadcast %cst_109 : f32 to vector<8x32xf32>
    %347 = arith.addf %346, %345 : vector<8x32xf32>
    %348 = arith.divf %346, %347 : vector<8x32xf32>
    %349 = arith.mulf %340, %315 : vector<8x32xf32>
    %350 = arith.mulf %334, %342 : vector<8x32xf32>
    %351 = arith.addf %349, %350 : vector<8x32xf32>
    %352 = math.tanh %351 : vector<8x32xf32>
    %353 = arith.mulf %348, %352 : vector<8x32xf32>
    %c8_i32_110 = arith.constant 8 : i32
    %354 = arith.muli %c0_i32_103, %c8_i32_110 : i32
    %c0_i32_111 = arith.constant 0 : i32
    %355 = arith.addi %c0_i32_111, %354 : i32
    %356 = tpu.assume_multiple %355, 8 : i32
    %357 = arith.index_cast %356 : i32 to index
    %c0_112 = arith.constant 0 : index
    %358 = vector.load %arg13[%357, %c0_112] : memref<64x32xf32, #tpu.memory_space<vmem>>, vector<8x32xf32>
    tpu.vector_store %arg13[%357, %c0_112], %353 {strides = array<i32>} : memref<64x32xf32, #tpu.memory_space<vmem>>, vector<8x32xf32>,
    %c1_i32_113 = arith.constant 1 : i32
    %c8_i32_114 = arith.constant 8 : i32
    %359 = arith.muli %c1_i32_113, %c8_i32_114 : i32
    %360 = tpu.assume_multiple %359, 8 : i32
    %361 = arith.index_cast %360 : i32 to index
    %c0_115 = arith.constant 0 : index
    %362 = vector.load %arg14[%361, %c0_115] : memref<64x128xf32, #tpu.memory_space<vmem>>, vector<8x128xf32>
    %363 = arith.truncf %353 : vector<8x32xf32> to vector<8x32xbf16>
    %cst_116 = arith.constant dense<0.000000e+00> : vector<8x128xf32>
    %364 = tpu.matmul %363, %310, %cst_116 {dimension_numbers = #tpu.dot_dimension_numbers<[1], [0], [0], [1], [0, 0, 1, 1], [], []>} : vector<8x32xbf16>, vector<32x128xbf16>, vector<8x128xf32> -> vector<8x128xf32>
    %365 = arith.addf %362, %364 : vector<8x128xf32>
    %366 = vector.extract_strided_slice %365 {offsets = [0, 0], sizes = [8, 32], strides = [1, 1]} : vector<8x128xf32> to vector<8x32xf32>
    %367 = arith.negf %366 : vector<8x32xf32>
    %368 = math.exp %367 : vector<8x32xf32>
    %cst_117 = arith.constant 1.000000e+00 : f32
    %369 = vector.broadcast %cst_117 : f32 to vector<8x32xf32>
    %370 = arith.addf %369, %368 : vector<8x32xf32>
    %371 = arith.divf %369, %370 : vector<8x32xf32>
    %372 = vector.extract_strided_slice %365 {offsets = [0, 32], sizes = [8, 32], strides = [1, 1]} : vector<8x128xf32> to vector<8x32xf32>
    %373 = arith.negf %372 : vector<8x32xf32>
    %374 = math.exp %373 : vector<8x32xf32>
    %cst_118 = arith.constant 1.000000e+00 : f32
    %375 = vector.broadcast %cst_118 : f32 to vector<8x32xf32>
    %376 = arith.addf %375, %374 : vector<8x32xf32>
    %377 = arith.divf %375, %376 : vector<8x32xf32>
    %378 = vector.extract_strided_slice %365 {offsets = [0, 64], sizes = [8, 32], strides = [1, 1]} : vector<8x128xf32> to vector<8x32xf32>
    %379 = math.tanh %378 : vector<8x32xf32>
    %380 = vector.extract_strided_slice %365 {offsets = [0, 96], sizes = [8, 32], strides = [1, 1]} : vector<8x128xf32> to vector<8x32xf32>
    %381 = arith.negf %380 : vector<8x32xf32>
    %382 = math.exp %381 : vector<8x32xf32>
    %cst_119 = arith.constant 1.000000e+00 : f32
    %383 = vector.broadcast %cst_119 : f32 to vector<8x32xf32>
    %384 = arith.addf %383, %382 : vector<8x32xf32>
    %385 = arith.divf %383, %384 : vector<8x32xf32>
    %386 = arith.mulf %377, %351 : vector<8x32xf32>
    %387 = arith.mulf %371, %379 : vector<8x32xf32>
    %388 = arith.addf %386, %387 : vector<8x32xf32>
    %389 = math.tanh %388 : vector<8x32xf32>
    %390 = arith.mulf %385, %389 : vector<8x32xf32>
    %c8_i32_120 = arith.constant 8 : i32
    %391 = arith.muli %c1_i32_113, %c8_i32_120 : i32
    %c0_i32_121 = arith.constant 0 : i32
    %392 = arith.addi %c0_i32_121, %391 : i32
    %393 = tpu.assume_multiple %392, 8 : i32
    %394 = arith.index_cast %393 : i32 to index
    %c0_122 = arith.constant 0 : index
    %395 = vector.load %arg13[%394, %c0_122] : memref<64x32xf32, #tpu.memory_space<vmem>>, vector<8x32xf32>
    tpu.vector_store %arg13[%394, %c0_122], %390 {strides = array<i32>} : memref<64x32xf32, #tpu.memory_space<vmem>>, vector<8x32xf32>,
    %c2_i32_123 = arith.constant 2 : i32
    %c8_i32_124 = arith.constant 8 : i32
    %396 = arith.muli %c2_i32_123, %c8_i32_124 : i32
    %397 = tpu.assume_multiple %396, 8 : i32
    %398 = arith.index_cast %397 : i32 to index
    %c0_125 = arith.constant 0 : index
    %399 = vector.load %arg14[%398, %c0_125] : memref<64x128xf32, #tpu.memory_space<vmem>>, vector<8x128xf32>
    %400 = arith.truncf %390 : vector<8x32xf32> to vector<8x32xbf16>
    %cst_126 = arith.constant dense<0.000000e+00> : vector<8x128xf32>
    %401 = tpu.matmul %400, %310, %cst_126 {dimension_numbers = #tpu.dot_dimension_numbers<[1], [0], [0], [1], [0, 0, 1, 1], [], []>} : vector<8x32xbf16>, vector<32x128xbf16>, vector<8x128xf32> -> vector<8x128xf32>
    %402 = arith.addf %399, %401 : vector<8x128xf32>
    %403 = vector.extract_strided_slice %402 {offsets = [0, 0], sizes = [8, 32], strides = [1, 1]} : vector<8x128xf32> to vector<8x32xf32>
    %404 = arith.negf %403 : vector<8x32xf32>
    %405 = math.exp %404 : vector<8x32xf32>
    %cst_127 = arith.constant 1.000000e+00 : f32
    %406 = vector.broadcast %cst_127 : f32 to vector<8x32xf32>
    %407 = arith.addf %406, %405 : vector<8x32xf32>
    %408 = arith.divf %406, %407 : vector<8x32xf32>
    %409 = vector.extract_strided_slice %402 {offsets = [0, 32], sizes = [8, 32], strides = [1, 1]} : vector<8x128xf32> to vector<8x32xf32>
    %410 = arith.negf %409 : vector<8x32xf32>
    %411 = math.exp %410 : vector<8x32xf32>
    %cst_128 = arith.constant 1.000000e+00 : f32
    %412 = vector.broadcast %cst_128 : f32 to vector<8x32xf32>
    %413 = arith.addf %412, %411 : vector<8x32xf32>
    %414 = arith.divf %412, %413 : vector<8x32xf32>
    %415 = vector.extract_strided_slice %402 {offsets = [0, 64], sizes = [8, 32], strides = [1, 1]} : vector<8x128xf32> to vector<8x32xf32>
    %416 = math.tanh %415 : vector<8x32xf32>
    %417 = vector.extract_strided_slice %402 {offsets = [0, 96], sizes = [8, 32], strides = [1, 1]} : vector<8x128xf32> to vector<8x32xf32>
    %418 = arith.negf %417 : vector<8x32xf32>
    %419 = math.exp %418 : vector<8x32xf32>
    %cst_129 = arith.constant 1.000000e+00 : f32
    %420 = vector.broadcast %cst_129 : f32 to vector<8x32xf32>
    %421 = arith.addf %420, %419 : vector<8x32xf32>
    %422 = arith.divf %420, %421 : vector<8x32xf32>
    %423 = arith.mulf %414, %388 : vector<8x32xf32>
    %424 = arith.mulf %408, %416 : vector<8x32xf32>
    %425 = arith.addf %423, %424 : vector<8x32xf32>
    %426 = math.tanh %425 : vector<8x32xf32>
    %427 = arith.mulf %422, %426 : vector<8x32xf32>
    %c8_i32_130 = arith.constant 8 : i32
    %428 = arith.muli %c2_i32_123, %c8_i32_130 : i32
    %c0_i32_131 = arith.constant 0 : i32
    %429 = arith.addi %c0_i32_131, %428 : i32
    %430 = tpu.assume_multiple %429, 8 : i32
    %431 = arith.index_cast %430 : i32 to index
    %c0_132 = arith.constant 0 : index
    %432 = vector.load %arg13[%431, %c0_132] : memref<64x32xf32, #tpu.memory_space<vmem>>, vector<8x32xf32>
    tpu.vector_store %arg13[%431, %c0_132], %427 {strides = array<i32>} : memref<64x32xf32, #tpu.memory_space<vmem>>, vector<8x32xf32>,
    %c3_i32_133 = arith.constant 3 : i32
    %c8_i32_134 = arith.constant 8 : i32
    %433 = arith.muli %c3_i32_133, %c8_i32_134 : i32
    %434 = tpu.assume_multiple %433, 8 : i32
    %435 = arith.index_cast %434 : i32 to index
    %c0_135 = arith.constant 0 : index
    %436 = vector.load %arg14[%435, %c0_135] : memref<64x128xf32, #tpu.memory_space<vmem>>, vector<8x128xf32>
    %437 = arith.truncf %427 : vector<8x32xf32> to vector<8x32xbf16>
    %cst_136 = arith.constant dense<0.000000e+00> : vector<8x128xf32>
    %438 = tpu.matmul %437, %310, %cst_136 {dimension_numbers = #tpu.dot_dimension_numbers<[1], [0], [0], [1], [0, 0, 1, 1], [], []>} : vector<8x32xbf16>, vector<32x128xbf16>, vector<8x128xf32> -> vector<8x128xf32>
    %439 = arith.addf %436, %438 : vector<8x128xf32>
    %440 = vector.extract_strided_slice %439 {offsets = [0, 0], sizes = [8, 32], strides = [1, 1]} : vector<8x128xf32> to vector<8x32xf32>
    %441 = arith.negf %440 : vector<8x32xf32>
    %442 = math.exp %441 : vector<8x32xf32>
    %cst_137 = arith.constant 1.000000e+00 : f32
    %443 = vector.broadcast %cst_137 : f32 to vector<8x32xf32>
    %444 = arith.addf %443, %442 : vector<8x32xf32>
    %445 = arith.divf %443, %444 : vector<8x32xf32>
    %446 = vector.extract_strided_slice %439 {offsets = [0, 32], sizes = [8, 32], strides = [1, 1]} : vector<8x128xf32> to vector<8x32xf32>
    %447 = arith.negf %446 : vector<8x32xf32>
    %448 = math.exp %447 : vector<8x32xf32>
    %cst_138 = arith.constant 1.000000e+00 : f32
    %449 = vector.broadcast %cst_138 : f32 to vector<8x32xf32>
    %450 = arith.addf %449, %448 : vector<8x32xf32>
    %451 = arith.divf %449, %450 : vector<8x32xf32>
    %452 = vector.extract_strided_slice %439 {offsets = [0, 64], sizes = [8, 32], strides = [1, 1]} : vector<8x128xf32> to vector<8x32xf32>
    %453 = math.tanh %452 : vector<8x32xf32>
    %454 = vector.extract_strided_slice %439 {offsets = [0, 96], sizes = [8, 32], strides = [1, 1]} : vector<8x128xf32> to vector<8x32xf32>
    %455 = arith.negf %454 : vector<8x32xf32>
    %456 = math.exp %455 : vector<8x32xf32>
    %cst_139 = arith.constant 1.000000e+00 : f32
    %457 = vector.broadcast %cst_139 : f32 to vector<8x32xf32>
    %458 = arith.addf %457, %456 : vector<8x32xf32>
    %459 = arith.divf %457, %458 : vector<8x32xf32>
    %460 = arith.mulf %451, %425 : vector<8x32xf32>
    %461 = arith.mulf %445, %453 : vector<8x32xf32>
    %462 = arith.addf %460, %461 : vector<8x32xf32>
    %463 = math.tanh %462 : vector<8x32xf32>
    %464 = arith.mulf %459, %463 : vector<8x32xf32>
    %c8_i32_140 = arith.constant 8 : i32
    %465 = arith.muli %c3_i32_133, %c8_i32_140 : i32
    %c0_i32_141 = arith.constant 0 : i32
    %466 = arith.addi %c0_i32_141, %465 : i32
    %467 = tpu.assume_multiple %466, 8 : i32
    %468 = arith.index_cast %467 : i32 to index
    %c0_142 = arith.constant 0 : index
    %469 = vector.load %arg13[%468, %c0_142] : memref<64x32xf32, #tpu.memory_space<vmem>>, vector<8x32xf32>
    tpu.vector_store %arg13[%468, %c0_142], %464 {strides = array<i32>} : memref<64x32xf32, #tpu.memory_space<vmem>>, vector<8x32xf32>,
    %c4_i32_143 = arith.constant 4 : i32
    %c8_i32_144 = arith.constant 8 : i32
    %470 = arith.muli %c4_i32_143, %c8_i32_144 : i32
    %471 = tpu.assume_multiple %470, 8 : i32
    %472 = arith.index_cast %471 : i32 to index
    %c0_145 = arith.constant 0 : index
    %473 = vector.load %arg14[%472, %c0_145] : memref<64x128xf32, #tpu.memory_space<vmem>>, vector<8x128xf32>
    %474 = arith.truncf %464 : vector<8x32xf32> to vector<8x32xbf16>
    %cst_146 = arith.constant dense<0.000000e+00> : vector<8x128xf32>
    %475 = tpu.matmul %474, %310, %cst_146 {dimension_numbers = #tpu.dot_dimension_numbers<[1], [0], [0], [1], [0, 0, 1, 1], [], []>} : vector<8x32xbf16>, vector<32x128xbf16>, vector<8x128xf32> -> vector<8x128xf32>
    %476 = arith.addf %473, %475 : vector<8x128xf32>
    %477 = vector.extract_strided_slice %476 {offsets = [0, 0], sizes = [8, 32], strides = [1, 1]} : vector<8x128xf32> to vector<8x32xf32>
    %478 = arith.negf %477 : vector<8x32xf32>
    %479 = math.exp %478 : vector<8x32xf32>
    %cst_147 = arith.constant 1.000000e+00 : f32
    %480 = vector.broadcast %cst_147 : f32 to vector<8x32xf32>
    %481 = arith.addf %480, %479 : vector<8x32xf32>
    %482 = arith.divf %480, %481 : vector<8x32xf32>
    %483 = vector.extract_strided_slice %476 {offsets = [0, 32], sizes = [8, 32], strides = [1, 1]} : vector<8x128xf32> to vector<8x32xf32>
    %484 = arith.negf %483 : vector<8x32xf32>
    %485 = math.exp %484 : vector<8x32xf32>
    %cst_148 = arith.constant 1.000000e+00 : f32
    %486 = vector.broadcast %cst_148 : f32 to vector<8x32xf32>
    %487 = arith.addf %486, %485 : vector<8x32xf32>
    %488 = arith.divf %486, %487 : vector<8x32xf32>
    %489 = vector.extract_strided_slice %476 {offsets = [0, 64], sizes = [8, 32], strides = [1, 1]} : vector<8x128xf32> to vector<8x32xf32>
    %490 = math.tanh %489 : vector<8x32xf32>
    %491 = vector.extract_strided_slice %476 {offsets = [0, 96], sizes = [8, 32], strides = [1, 1]} : vector<8x128xf32> to vector<8x32xf32>
    %492 = arith.negf %491 : vector<8x32xf32>
    %493 = math.exp %492 : vector<8x32xf32>
    %cst_149 = arith.constant 1.000000e+00 : f32
    %494 = vector.broadcast %cst_149 : f32 to vector<8x32xf32>
    %495 = arith.addf %494, %493 : vector<8x32xf32>
    %496 = arith.divf %494, %495 : vector<8x32xf32>
    %497 = arith.mulf %488, %462 : vector<8x32xf32>
    %498 = arith.mulf %482, %490 : vector<8x32xf32>
    %499 = arith.addf %497, %498 : vector<8x32xf32>
    %500 = math.tanh %499 : vector<8x32xf32>
    %501 = arith.mulf %496, %500 : vector<8x32xf32>
    %c8_i32_150 = arith.constant 8 : i32
    %502 = arith.muli %c4_i32_143, %c8_i32_150 : i32
    %c0_i32_151 = arith.constant 0 : i32
    %503 = arith.addi %c0_i32_151, %502 : i32
    %504 = tpu.assume_multiple %503, 8 : i32
    %505 = arith.index_cast %504 : i32 to index
    %c0_152 = arith.constant 0 : index
    %506 = vector.load %arg13[%505, %c0_152] : memref<64x32xf32, #tpu.memory_space<vmem>>, vector<8x32xf32>
    tpu.vector_store %arg13[%505, %c0_152], %501 {strides = array<i32>} : memref<64x32xf32, #tpu.memory_space<vmem>>, vector<8x32xf32>,
    %c5_i32_153 = arith.constant 5 : i32
    %c8_i32_154 = arith.constant 8 : i32
    %507 = arith.muli %c5_i32_153, %c8_i32_154 : i32
    %508 = tpu.assume_multiple %507, 8 : i32
    %509 = arith.index_cast %508 : i32 to index
    %c0_155 = arith.constant 0 : index
    %510 = vector.load %arg14[%509, %c0_155] : memref<64x128xf32, #tpu.memory_space<vmem>>, vector<8x128xf32>
    %511 = arith.truncf %501 : vector<8x32xf32> to vector<8x32xbf16>
    %cst_156 = arith.constant dense<0.000000e+00> : vector<8x128xf32>
    %512 = tpu.matmul %511, %310, %cst_156 {dimension_numbers = #tpu.dot_dimension_numbers<[1], [0], [0], [1], [0, 0, 1, 1], [], []>} : vector<8x32xbf16>, vector<32x128xbf16>, vector<8x128xf32> -> vector<8x128xf32>
    %513 = arith.addf %510, %512 : vector<8x128xf32>
    %514 = vector.extract_strided_slice %513 {offsets = [0, 0], sizes = [8, 32], strides = [1, 1]} : vector<8x128xf32> to vector<8x32xf32>
    %515 = arith.negf %514 : vector<8x32xf32>
    %516 = math.exp %515 : vector<8x32xf32>
    %cst_157 = arith.constant 1.000000e+00 : f32
    %517 = vector.broadcast %cst_157 : f32 to vector<8x32xf32>
    %518 = arith.addf %517, %516 : vector<8x32xf32>
    %519 = arith.divf %517, %518 : vector<8x32xf32>
    %520 = vector.extract_strided_slice %513 {offsets = [0, 32], sizes = [8, 32], strides = [1, 1]} : vector<8x128xf32> to vector<8x32xf32>
    %521 = arith.negf %520 : vector<8x32xf32>
    %522 = math.exp %521 : vector<8x32xf32>
    %cst_158 = arith.constant 1.000000e+00 : f32
    %523 = vector.broadcast %cst_158 : f32 to vector<8x32xf32>
    %524 = arith.addf %523, %522 : vector<8x32xf32>
    %525 = arith.divf %523, %524 : vector<8x32xf32>
    %526 = vector.extract_strided_slice %513 {offsets = [0, 64], sizes = [8, 32], strides = [1, 1]} : vector<8x128xf32> to vector<8x32xf32>
    %527 = math.tanh %526 : vector<8x32xf32>
    %528 = vector.extract_strided_slice %513 {offsets = [0, 96], sizes = [8, 32], strides = [1, 1]} : vector<8x128xf32> to vector<8x32xf32>
    %529 = arith.negf %528 : vector<8x32xf32>
    %530 = math.exp %529 : vector<8x32xf32>
    %cst_159 = arith.constant 1.000000e+00 : f32
    %531 = vector.broadcast %cst_159 : f32 to vector<8x32xf32>
    %532 = arith.addf %531, %530 : vector<8x32xf32>
    %533 = arith.divf %531, %532 : vector<8x32xf32>
    %534 = arith.mulf %525, %499 : vector<8x32xf32>
    %535 = arith.mulf %519, %527 : vector<8x32xf32>
    %536 = arith.addf %534, %535 : vector<8x32xf32>
    %537 = math.tanh %536 : vector<8x32xf32>
    %538 = arith.mulf %533, %537 : vector<8x32xf32>
    %c8_i32_160 = arith.constant 8 : i32
    %539 = arith.muli %c5_i32_153, %c8_i32_160 : i32
    %c0_i32_161 = arith.constant 0 : i32
    %540 = arith.addi %c0_i32_161, %539 : i32
    %541 = tpu.assume_multiple %540, 8 : i32
    %542 = arith.index_cast %541 : i32 to index
    %c0_162 = arith.constant 0 : index
    %543 = vector.load %arg13[%542, %c0_162] : memref<64x32xf32, #tpu.memory_space<vmem>>, vector<8x32xf32>
    tpu.vector_store %arg13[%542, %c0_162], %538 {strides = array<i32>} : memref<64x32xf32, #tpu.memory_space<vmem>>, vector<8x32xf32>,
    %c6_i32_163 = arith.constant 6 : i32
    %c8_i32_164 = arith.constant 8 : i32
    %544 = arith.muli %c6_i32_163, %c8_i32_164 : i32
    %545 = tpu.assume_multiple %544, 8 : i32
    %546 = arith.index_cast %545 : i32 to index
    %c0_165 = arith.constant 0 : index
    %547 = vector.load %arg14[%546, %c0_165] : memref<64x128xf32, #tpu.memory_space<vmem>>, vector<8x128xf32>
    %548 = arith.truncf %538 : vector<8x32xf32> to vector<8x32xbf16>
    %cst_166 = arith.constant dense<0.000000e+00> : vector<8x128xf32>
    %549 = tpu.matmul %548, %310, %cst_166 {dimension_numbers = #tpu.dot_dimension_numbers<[1], [0], [0], [1], [0, 0, 1, 1], [], []>} : vector<8x32xbf16>, vector<32x128xbf16>, vector<8x128xf32> -> vector<8x128xf32>
    %550 = arith.addf %547, %549 : vector<8x128xf32>
    %551 = vector.extract_strided_slice %550 {offsets = [0, 0], sizes = [8, 32], strides = [1, 1]} : vector<8x128xf32> to vector<8x32xf32>
    %552 = arith.negf %551 : vector<8x32xf32>
    %553 = math.exp %552 : vector<8x32xf32>
    %cst_167 = arith.constant 1.000000e+00 : f32
    %554 = vector.broadcast %cst_167 : f32 to vector<8x32xf32>
    %555 = arith.addf %554, %553 : vector<8x32xf32>
    %556 = arith.divf %554, %555 : vector<8x32xf32>
    %557 = vector.extract_strided_slice %550 {offsets = [0, 32], sizes = [8, 32], strides = [1, 1]} : vector<8x128xf32> to vector<8x32xf32>
    %558 = arith.negf %557 : vector<8x32xf32>
    %559 = math.exp %558 : vector<8x32xf32>
    %cst_168 = arith.constant 1.000000e+00 : f32
    %560 = vector.broadcast %cst_168 : f32 to vector<8x32xf32>
    %561 = arith.addf %560, %559 : vector<8x32xf32>
    %562 = arith.divf %560, %561 : vector<8x32xf32>
    %563 = vector.extract_strided_slice %550 {offsets = [0, 64], sizes = [8, 32], strides = [1, 1]} : vector<8x128xf32> to vector<8x32xf32>
    %564 = math.tanh %563 : vector<8x32xf32>
    %565 = vector.extract_strided_slice %550 {offsets = [0, 96], sizes = [8, 32], strides = [1, 1]} : vector<8x128xf32> to vector<8x32xf32>
    %566 = arith.negf %565 : vector<8x32xf32>
    %567 = math.exp %566 : vector<8x32xf32>
    %cst_169 = arith.constant 1.000000e+00 : f32
    %568 = vector.broadcast %cst_169 : f32 to vector<8x32xf32>
    %569 = arith.addf %568, %567 : vector<8x32xf32>
    %570 = arith.divf %568, %569 : vector<8x32xf32>
    %571 = arith.mulf %562, %536 : vector<8x32xf32>
    %572 = arith.mulf %556, %564 : vector<8x32xf32>
    %573 = arith.addf %571, %572 : vector<8x32xf32>
    %574 = math.tanh %573 : vector<8x32xf32>
    %575 = arith.mulf %570, %574 : vector<8x32xf32>
    %c8_i32_170 = arith.constant 8 : i32
    %576 = arith.muli %c6_i32_163, %c8_i32_170 : i32
    %c0_i32_171 = arith.constant 0 : i32
    %577 = arith.addi %c0_i32_171, %576 : i32
    %578 = tpu.assume_multiple %577, 8 : i32
    %579 = arith.index_cast %578 : i32 to index
    %c0_172 = arith.constant 0 : index
    %580 = vector.load %arg13[%579, %c0_172] : memref<64x32xf32, #tpu.memory_space<vmem>>, vector<8x32xf32>
    tpu.vector_store %arg13[%579, %c0_172], %575 {strides = array<i32>} : memref<64x32xf32, #tpu.memory_space<vmem>>, vector<8x32xf32>,
    %c7_i32_173 = arith.constant 7 : i32
    %c8_i32_174 = arith.constant 8 : i32
    %581 = arith.muli %c7_i32_173, %c8_i32_174 : i32
    %582 = tpu.assume_multiple %581, 8 : i32
    %583 = arith.index_cast %582 : i32 to index
    %c0_175 = arith.constant 0 : index
    %584 = vector.load %arg14[%583, %c0_175] : memref<64x128xf32, #tpu.memory_space<vmem>>, vector<8x128xf32>
    %585 = arith.truncf %575 : vector<8x32xf32> to vector<8x32xbf16>
    %cst_176 = arith.constant dense<0.000000e+00> : vector<8x128xf32>
    %586 = tpu.matmul %585, %310, %cst_176 {dimension_numbers = #tpu.dot_dimension_numbers<[1], [0], [0], [1], [0, 0, 1, 1], [], []>} : vector<8x32xbf16>, vector<32x128xbf16>, vector<8x128xf32> -> vector<8x128xf32>
    %587 = arith.addf %584, %586 : vector<8x128xf32>
    %588 = vector.extract_strided_slice %587 {offsets = [0, 0], sizes = [8, 32], strides = [1, 1]} : vector<8x128xf32> to vector<8x32xf32>
    %589 = arith.negf %588 : vector<8x32xf32>
    %590 = math.exp %589 : vector<8x32xf32>
    %cst_177 = arith.constant 1.000000e+00 : f32
    %591 = vector.broadcast %cst_177 : f32 to vector<8x32xf32>
    %592 = arith.addf %591, %590 : vector<8x32xf32>
    %593 = arith.divf %591, %592 : vector<8x32xf32>
    %594 = vector.extract_strided_slice %587 {offsets = [0, 32], sizes = [8, 32], strides = [1, 1]} : vector<8x128xf32> to vector<8x32xf32>
    %595 = arith.negf %594 : vector<8x32xf32>
    %596 = math.exp %595 : vector<8x32xf32>
    %cst_178 = arith.constant 1.000000e+00 : f32
    %597 = vector.broadcast %cst_178 : f32 to vector<8x32xf32>
    %598 = arith.addf %597, %596 : vector<8x32xf32>
    %599 = arith.divf %597, %598 : vector<8x32xf32>
    %600 = vector.extract_strided_slice %587 {offsets = [0, 64], sizes = [8, 32], strides = [1, 1]} : vector<8x128xf32> to vector<8x32xf32>
    %601 = math.tanh %600 : vector<8x32xf32>
    %602 = vector.extract_strided_slice %587 {offsets = [0, 96], sizes = [8, 32], strides = [1, 1]} : vector<8x128xf32> to vector<8x32xf32>
    %603 = arith.negf %602 : vector<8x32xf32>
    %604 = math.exp %603 : vector<8x32xf32>
    %cst_179 = arith.constant 1.000000e+00 : f32
    %605 = vector.broadcast %cst_179 : f32 to vector<8x32xf32>
    %606 = arith.addf %605, %604 : vector<8x32xf32>
    %607 = arith.divf %605, %606 : vector<8x32xf32>
    %608 = arith.mulf %599, %573 : vector<8x32xf32>
    %609 = arith.mulf %593, %601 : vector<8x32xf32>
    %610 = arith.addf %608, %609 : vector<8x32xf32>
    %611 = math.tanh %610 : vector<8x32xf32>
    %612 = arith.mulf %607, %611 : vector<8x32xf32>
    %c8_i32_180 = arith.constant 8 : i32
    %613 = arith.muli %c7_i32_173, %c8_i32_180 : i32
    %c0_i32_181 = arith.constant 0 : i32
    %614 = arith.addi %c0_i32_181, %613 : i32
    %615 = tpu.assume_multiple %614, 8 : i32
    %616 = arith.index_cast %615 : i32 to index
    %c0_182 = arith.constant 0 : index
    %617 = vector.load %arg13[%616, %c0_182] : memref<64x32xf32, #tpu.memory_space<vmem>>, vector<8x32xf32>
    tpu.vector_store %arg13[%616, %c0_182], %612 {strides = array<i32>} : memref<64x32xf32, #tpu.memory_space<vmem>>, vector<8x32xf32>,
    %c8_i32_183 = arith.constant 8 : i32
    %c32 = arith.constant 32 : index
    %c0_184 = arith.constant 0 : index
    %618 = vector.load %arg13[%c32, %c0_184] : memref<64x32xf32, #tpu.memory_space<vmem>>, vector<32x32xf32>
    %619 = arith.truncf %618 : vector<32x32xf32> to vector<32x32xbf16>
    %c0_185 = arith.constant 0 : index
    %c0_186 = arith.constant 0 : index
    %620 = vector.load %arg9[%c0_185, %c0_186] : memref<32x128xbf16, #tpu.memory_space<vmem>>, vector<32x128xbf16>
    %cst_187 = arith.constant dense<0.000000e+00> : vector<32x128xf32>
    %621 = tpu.matmul %619, %620, %cst_187 {dimension_numbers = #tpu.dot_dimension_numbers<[1], [0], [0], [1], [0, 0, 1, 1], [], []>} : vector<32x32xbf16>, vector<32x128xbf16>, vector<32x128xf32> -> vector<32x128xf32>
    %c0_188 = arith.constant 0 : index
    %c0_189 = arith.constant 0 : index
    %622 = vector.load %arg10[%c0_188, %c0_189] : memref<1x128xf32, #tpu.memory_space<vmem>>, vector<1x128xf32>
    %623 = vector.broadcast %622 : vector<1x128xf32> to vector<32x128xf32>
    %624 = arith.addf %621, %623 : vector<32x128xf32>
    %c0_190 = arith.constant 0 : index
    %c0_191 = arith.constant 0 : index
    %625 = vector.load %arg11[%c0_190, %c0_191] : memref<32x128xf32, #tpu.memory_space<vmem>>, vector<32x128xf32>
    tpu.vector_store %arg11[%c0_190, %c0_191], %624 {strides = array<i32>} : memref<32x128xf32, #tpu.memory_space<vmem>>, vector<32x128xf32>,
    return
  }
}

</mosaic_0001>

<bundles_post_ra>
// kernel: _forward_impl.1
= control target key start
LH: loop header
LB: loop body
LE: loop exit
PB: predicated region body
PF: predicated region fallthrough
CT: control target
= control target key end

     0   :  { %16 = vsyncpa [#allocation6], 0  ;;  %s3136_s0 = inlined_call_operand.hbm [shape: f32[64,4], index: 0, kind: input, shape index: {}]   ;;  %s3137_s1 = inlined_call_operand.hbm [shape: bf16[4,128], index: 1, kind: input, shape index: {}]   ;;  %s3138_s2 = inlined_call_operand.hbm [shape: bf16[32,128], index: 2, kind: input, shape index: {}]   ;;  %s3139_s3 = inlined_call_operand.hbm [shape: f32[1,128], index: 3, kind: input, shape index: {}]   ;;  %s3140_s4 = inlined_call_operand.hbm [shape: bf16[32,128], index: 4, kind: input, shape index: {}]   ;;  %s3141_s5 = inlined_call_operand.hbm [shape: bf16[32,128], index: 5, kind: input, shape index: {}]   ;;  %s3142_s6 = inlined_call_operand.hbm [shape: f32[1,128], index: 6, kind: input, shape index: {}]   ;;  %s3143_s7 = inlined_call_operand.hbm [shape: f32[2,8,32], index: 7, kind: input, shape index: {}]   ;;  %s3144_s8 = inlined_call_operand.hbm [shape: f32[2,8,32], index: 8, kind: input, shape index: {}]   ;;  %s3145_s9 = inlined_call_operand.hbm [shape: bf16[32,128], index: 9, kind: input, shape index: {}]   ;;  %s3146_s10 = inlined_call_operand.hbm [shape: f32[1,128], index: 10, kind: input, shape index: {}]   ;;  %s3147_s11 = inlined_call_operand.hbm [shape: f32[32,128], index: 11, kind: output, shape index: {}]  }
   0x1   :  { %17 = vsyncpa [#allocation9], 0 }
   0x2   :  { %18 = vsyncpa [#allocation12], 0 }
   0x3   :  { %19 = vsyncpa [#allocation15], 0 }
   0x4   :  { %20 = vsyncpa [#allocation18], 0 }
   0x5   :  { %21 = vsyncpa [#allocation21], 0 }
   0x6   :  { %22 = vsyncpa [#allocation7], 0  ;;  %s2539_s17 = smov [#allocation8]   ;;  %s2540_s19 = smov [#allocation11]  }
   0x7   :  { %s41_s18 = sshll.u32 %s2539_s17, 4  ;;  %s63_s20 = sshll.u32 %s2540_s19, 4  ;;  %s42_s18 = int_to_ptr.vmem [resolvable:$true] %s41_s18  ;;  %s64_s20 = int_to_ptr.vmem [resolvable:$true] %s63_s20 }
   0x8   :  { %s2261_s23 = scalar_lea.hbm %s3137_s1, 32 }
   0x9   :  { %p2262_p0 = scmp.ne.s32.totalorder %s3137_s1, %s2261_s23  ;;  %p2265_p1 = scmp.lt.u32.totalorder %s2261_s23, %s3137_s1 }
   0xb   :  { %p2267_p2 = pnand %p2265_p1, %p2262_p0 }
   0xd   :  { %2270 = shalt.err (!%p2267_p2)
}
   0xe   :  { %s2271_s28 = scalar_lea.vmem %s42_s18, 32  ;;  %p2276_p4 = scmp.lt.s32.totalorder %s42_s18, %s42_s18 }
   0xf   :  { %p2272_p3 = scmp.ne.s32.totalorder %s42_s18, %s2271_s28  ;;  %p2277_p5 = scmp.lt.s32.totalorder %s2271_s28, %s2271_s28 }
  0x11   :  { %p2278_p6 = por %p2277_p5, %p2276_p4 }
  0x13   :  { %p2279_p7 = pnand %p2278_p6, %p2272_p3 }
  0x15   :  { %2282 = shalt.err (!%p2279_p7)
}
  0x16   :  { %44 = dma.hbm_to_vmem [thread:$0]  %s3137_s1, 32, %s42_s18, [#allocation9]  }
  0x17   :  { %s2283_s14 = scalar_lea.hbm %s3139_s3, 16 }
  0x18   :  { %p2284_p8 = scmp.ne.s32.totalorder %s3139_s3, %s2283_s14  ;;  %p2287_p9 = scmp.lt.u32.totalorder %s2283_s14, %s3139_s3 }
  0x1a   :  { %p2289_p10 = pnand %p2287_p9, %p2284_p8 }
  0x1c   :  { %2292 = shalt.err (!%p2289_p10)
}
  0x1d   :  { %s2293_s21 = scalar_lea.vmem %s64_s20, 16  ;;  %s2297_s22 = scalar_lea.vmem %s64_s20, 32 }
  0x1e   :  { %p2294_p11 = scmp.ne.s32.totalorder %s64_s20, %s2293_s21  ;;  %p2298_p12 = scmp.lt.s32.totalorder %s64_s20, %s64_s20 }
  0x1f   :  { %p2299_p13 = scmp.lt.s32.totalorder %s2297_s22, %s2293_s21 }
  0x21   :  { %p2300_p0 = por %p2299_p13, %p2298_p12 }
  0x23   :  { %p2301_p1 = pnand %p2300_p0, %p2294_p11 }
  0x25   :  { %2304 = shalt.err (!%p2301_p1)
}
  0x26   :  { %66 = dma.hbm_to_vmem [thread:$0]  %s3139_s3, 16, %s64_s20, [#allocation12]  }
  0x27   :  { %s2541_s23 = smov [#allocation14]   ;;  %s2305_s27 = scalar_lea.hbm %s3141_s5, 256 }
  0x28   :  { %s84_s24 = sshll.u32 %s2541_s23, 4  ;;  %p2306_p2 = scmp.ne.s32.totalorder %s3141_s5, %s2305_s27  ;;  %s85_s24 = int_to_ptr.vmem [resolvable:$true] %s84_s24 }
  0x29   :  { %p2309_p3 = scmp.lt.u32.totalorder %s2305_s27, %s3141_s5 }
  0x2b   :  { %p2311_p4 = pnand %p2309_p3, %p2306_p2 }
  0x2d   :  { %2314 = shalt.err (!%p2311_p4)
}
  0x2e   :  { %s2315_s13 = scalar_lea.vmem %s85_s24, 256  ;;  %p2320_p6 = scmp.lt.s32.totalorder %s85_s24, %s85_s24 }
  0x2f   :  { %p2316_p5 = scmp.ne.s32.totalorder %s85_s24, %s2315_s13  ;;  %p2321_p7 = scmp.lt.s32.totalorder %s2315_s13, %s2315_s13 }
  0x31   :  { %p2322_p8 = por %p2321_p7, %p2320_p6 }
  0x33   :  { %p2323_p9 = pnand %p2322_p8, %p2316_p5 }
  0x35   :  { %2326 = shalt.err (!%p2323_p9)
}
  0x36   :  { %s2542_s3 = smov 64   ;;  %s2543_s20 = smov 4  }
  0x37   :  { %90 = dma.hbm_to_vmem [thread:$0]  %s3141_s5, 256, %s85_s24, [#allocation15], %s2542_s3, %s2542_s3, %s2543_s20  }
  0x38   :  { %s2544_s16 = smov [#allocation17]   ;;  %s2545_s19 = smov [#allocation20]  }
  0x39   :  { %s106_s17 = sshll.u32 %s2544_s16, 4  ;;  %s130_s21 = sshll.u32 %s2545_s19, 4  ;;  %s107_s17 = int_to_ptr.vmem [resolvable:$true] %s106_s17  ;;  %s131_s21 = int_to_ptr.vmem [resolvable:$true] %s130_s21 }
  0x3a   :  { %s2327_s18 = scalar_lea.hbm %s3143_s7, 256 }
  0x3b   :  { %p2328_p10 = scmp.ne.s32.totalorder %s3143_s7, %s2327_s18  ;;  %p2331_p11 = scmp.lt.u32.totalorder %s2327_s18, %s3143_s7 }
  0x3d   :  { %p2333_p12 = pnand %p2331_p11, %p2328_p10 }
  0x3f   :  { %2336 = shalt.err (!%p2333_p12)
}
  0x40   :  { %s2337_s5 = scalar_lea.vmem %s107_s17, 256  ;;  %p2342_p0 = scmp.lt.s32.totalorder %s107_s17, %s107_s17 }
  0x41   :  { %p2338_p13 = scmp.ne.s32.totalorder %s107_s17, %s2337_s5  ;;  %p2343_p1 = scmp.lt.s32.totalorder %s2337_s5, %s2337_s5 }
  0x43   :  { %p2344_p2 = por %p2343_p1, %p2342_p0 }
  0x45   :  { %p2345_p3 = pnand %p2344_p2, %p2338_p13 }
  0x47   :  { %2348 = shalt.err (!%p2345_p3)
}
  0x48   :  { %s2546_s24 = smov 128   ;;  %s2547_s28 = smov 8  }
  0x49   :  { %112 = dma.hbm_to_vmem [thread:$0]  %s3143_s7, 256, %s107_s17, [#allocation18], %s2546_s24, %s2546_s24, %s2547_s28  }
  0x4a   :  { %s2349_s14 = scalar_lea.hbm %s3145_s9, 256 }
  0x4b   :  { %p2350_p4 = scmp.ne.s32.totalorder %s3145_s9, %s2349_s14  ;;  %p2353_p5 = scmp.lt.u32.totalorder %s2349_s14, %s3145_s9 }
  0x4d   :  { %p2355_p6 = pnand %p2353_p5, %p2350_p4 }
  0x4f   :  { %2358 = shalt.err (!%p2355_p6)
}
  0x50   :  { %s2359_s1 = scalar_lea.vmem %s131_s21, 256  ;;  %p2364_p8 = scmp.lt.s32.totalorder %s131_s21, %s131_s21 }
  0x51   :  { %p2360_p7 = scmp.ne.s32.totalorder %s131_s21, %s2359_s1  ;;  %p2365_p9 = scmp.lt.s32.totalorder %s2359_s1, %s2359_s1 }
  0x53   :  { %p2366_p10 = por %p2365_p9, %p2364_p8 }
  0x55   :  { %p2367_p11 = pnand %p2366_p10, %p2360_p7 }
  0x57   :  { %2370 = shalt.err (!%p2367_p11)
}
  0x58   :  { %136 = dma.hbm_to_vmem [thread:$0]  %s3145_s9, 256, %s131_s21, [#allocation21], %s2542_s3, %s2542_s3, %s2543_s20  }
  0x59   :  { %s2548_s18 = smov [#allocation5]   ;;  %s2549_s25 = smov [#allocation10]  }
  0x5a   :  { %s28_s23 = sshll.u32 %s2548_s18, 4  ;;  %s50_s26 = sshll.u32 %s2549_s25, 4  ;;  %s29_s23 = int_to_ptr.vmem [resolvable:$true] %s28_s23  ;;  %s51_s26 = int_to_ptr.vmem [resolvable:$true] %s50_s26 }
  0x5b   :  { %s2371_s29 = scalar_lea.hbm %s3136_s0, 1024 }
  0x5c   :  { %p2372_p12 = scmp.ne.s32.totalorder %s3136_s0, %s2371_s29  ;;  %p2375_p13 = scmp.lt.u32.totalorder %s2371_s29, %s3136_s0 }
  0x5e   :  { %p2377_p0 = pnand %p2375_p13, %p2372_p12 }
  0x60   :  { %2380 = shalt.err (!%p2377_p0)
}
  0x61   :  { %s2381_s9 = scalar_lea.vmem %s29_s23, 1024  ;;  %p2386_p2 = scmp.lt.s32.totalorder %s29_s23, %s29_s23 }
  0x62   :  { %p2382_p1 = scmp.ne.s32.totalorder %s29_s23, %s2381_s9  ;;  %p2387_p3 = scmp.lt.s32.totalorder %s2381_s9, %s2381_s9 }
  0x64   :  { %p2388_p4 = por %p2387_p3, %p2386_p2 }
  0x66   :  { %p2389_p5 = pnand %p2388_p4, %p2382_p1 }
  0x68   :  { %2392 = shalt.err (!%p2389_p5)
}
  0x69   :  { %34 = dma.hbm_to_vmem [thread:$0]  %s3136_s0, 1024, %s29_s23, [#allocation6], %s2546_s24, %s2546_s24, %s2547_s28  }
  0x6a   :  { %s2393_s22 = scalar_lea.hbm %s3138_s2, 256 }
  0x6b   :  { %p2394_p6 = scmp.ne.s32.totalorder %s3138_s2, %s2393_s22  ;;  %p2397_p7 = scmp.lt.u32.totalorder %s2393_s22, %s3138_s2 }
  0x6d   :  { %p2399_p8 = pnand %p2397_p7, %p2394_p6 }
  0x6f   :  { %2402 = shalt.err (!%p2399_p8)
}
  0x70   :  { %s2403_s25 = scalar_lea.vmem %s51_s26, 256  ;;  %p2408_p10 = scmp.lt.s32.totalorder %s51_s26, %s51_s26 }
  0x71   :  { %p2404_p9 = scmp.ne.s32.totalorder %s51_s26, %s2403_s25  ;;  %p2409_p11 = scmp.lt.s32.totalorder %s2403_s25, %s2403_s25 }
  0x73   :  { %p2410_p12 = por %p2409_p11, %p2408_p10 }
  0x75   :  { %p2411_p13 = pnand %p2410_p12, %p2404_p9 }
  0x77   :  { %2414 = shalt.err (!%p2411_p13)
}
  0x78   :  { %56 = dma.hbm_to_vmem [thread:$0]  %s3138_s2, 256, %s51_s26, [#allocation9], %s2542_s3, %s2542_s3, %s2543_s20  }
  0x79   :  { %s2550_s27 = smov [#allocation13]   ;;  %s2551_s29 = smov [#allocation16]  }
  0x7a   :  { %s72_s5 = sshll.u32 %s2550_s27, 4  ;;  %s97_s30 = sshll.u32 %s2551_s29, 4  ;;  %s73_s5 = int_to_ptr.vmem [resolvable:$true] %s72_s5  ;;  %s98_s30 = int_to_ptr.vmem [resolvable:$true] %s97_s30 }
  0x7b   :  { %s2415_s14 = scalar_lea.hbm %s3140_s4, 256 }
  0x7c   :  { %p2416_p0 = scmp.ne.s32.totalorder %s3140_s4, %s2415_s14  ;;  %p2419_p1 = scmp.lt.u32.totalorder %s2415_s14, %s3140_s4 }
  0x7e   :  { %p2421_p2 = pnand %p2419_p1, %p2416_p0 }
  0x80   :  { %2424 = shalt.err (!%p2421_p2)
}
  0x81   :  { %s2425_s2 = scalar_lea.vmem %s73_s5, 256  ;;  %p2430_p4 = scmp.lt.s32.totalorder %s73_s5, %s73_s5 }
  0x82   :  { %p2426_p3 = scmp.ne.s32.totalorder %s73_s5, %s2425_s2  ;;  %p2431_p5 = scmp.lt.s32.totalorder %s2425_s2, %s2425_s2 }
  0x84   :  { %p2432_p6 = por %p2431_p5, %p2430_p4 }
  0x86   :  { %p2433_p7 = pnand %p2432_p6, %p2426_p3 }
  0x88   :  { %2436 = shalt.err (!%p2433_p7)
}
  0x89   :  { %78 = dma.hbm_to_vmem [thread:$0]  %s3140_s4, 256, %s73_s5, [#allocation12], %s2542_s3, %s2542_s3, %s2543_s20  }
  0x8a   :  { %s2437_s7 = scalar_lea.hbm %s3142_s6, 16 }
  0x8b   :  { %p2438_p8 = scmp.ne.s32.totalorder %s3142_s6, %s2437_s7  ;;  %p2441_p9 = scmp.lt.u32.totalorder %s2437_s7, %s3142_s6 }
  0x8d   :  { %p2443_p10 = pnand %p2441_p9, %p2438_p8 }
  0x8f   :  { %2446 = shalt.err (!%p2443_p10)
}
  0x90   :  { %s2447_s23 = scalar_lea.vmem %s98_s30, 16  ;;  %s2451_s27 = scalar_lea.vmem %s98_s30, 32 }
  0x91   :  { %p2448_p11 = scmp.ne.s32.totalorder %s98_s30, %s2447_s23  ;;  %p2452_p12 = scmp.lt.s32.totalorder %s98_s30, %s98_s30 }
  0x92   :  { %p2453_p13 = scmp.lt.s32.totalorder %s2451_s27, %s2447_s23 }
  0x94   :  { %p2454_p0 = por %p2453_p13, %p2452_p12 }
  0x96   :  { %p2455_p1 = pnand %p2454_p0, %p2448_p11 }
  0x98   :  { %2458 = shalt.err (!%p2455_p1)
}
  0x99   :  { %100 = dma.hbm_to_vmem [thread:$0]  %s3142_s6, 16, %s98_s30, [#allocation15]  }
  0x9a   :  { %s2552_s5 = smov [#allocation19]   ;;  %s2553_s12 = smov [#allocation22]  }
  0x9b   :  { %s118_s29 = sshll.u32 %s2552_s5, 4  ;;  %s143_s13 = sshll.u32 %s2553_s12, 4  ;;  %s119_s29 = int_to_ptr.vmem [resolvable:$true] %s118_s29  ;;  %s144_s13 = int_to_ptr.vmem [resolvable:$true] %s143_s13 }
  0x9c   :  { %s2459_s21 = scalar_lea.hbm %s3144_s8, 256 }
  0x9d   :  { %p2460_p2 = scmp.ne.s32.totalorder %s3144_s8, %s2459_s21  ;;  %p2463_p3 = scmp.lt.u32.totalorder %s2459_s21, %s3144_s8 }
  0x9f   :  { %p2465_p4 = pnand %p2463_p3, %p2460_p2 }
  0xa1   :  { %2468 = shalt.err (!%p2465_p4)
}
  0xa2   :  { %s2469_s6 = scalar_lea.vmem %s119_s29, 256  ;;  %p2474_p6 = scmp.lt.s32.totalorder %s119_s29, %s119_s29 }
  0xa3   :  { %p2470_p5 = scmp.ne.s32.totalorder %s119_s29, %s2469_s6  ;;  %p2475_p7 = scmp.lt.s32.totalorder %s2469_s6, %s2469_s6 }
  0xa5   :  { %p2476_p8 = por %p2475_p7, %p2474_p6 }
  0xa7   :  { %p2477_p9 = pnand %p2476_p8, %p2470_p5 }
  0xa9   :  { %2480 = shalt.err (!%p2477_p9)
}
  0xaa   :  { %124 = dma.hbm_to_vmem [thread:$0]  %s3144_s8, 256, %s119_s29, [#allocation18], %s2546_s24, %s2546_s24, %s2547_s28  }
  0xab   :  { %s2481_s7 = scalar_lea.hbm %s3146_s10, 16 }
  0xac   :  { %p2482_p10 = scmp.ne.s32.totalorder %s3146_s10, %s2481_s7  ;;  %p2485_p11 = scmp.lt.u32.totalorder %s2481_s7, %s3146_s10 }
  0xae   :  { %p2487_p12 = pnand %p2485_p11, %p2482_p10 }
  0xb0   :  { %2490 = shalt.err (!%p2487_p12)
}
  0xb1   :  { %s2491_s23 = scalar_lea.vmem %s144_s13, 16  ;;  %s2495_s27 = scalar_lea.vmem %s144_s13, 32 }
  0xb2   :  { %p2492_p13 = scmp.ne.s32.totalorder %s144_s13, %s2491_s23  ;;  %p2496_p0 = scmp.lt.s32.totalorder %s144_s13, %s144_s13 }
  0xb3   :  { %p2497_p1 = scmp.lt.s32.totalorder %s2495_s27, %s2491_s23 }
  0xb5   :  { %p2498_p2 = por %p2497_p1, %p2496_p0 }
  0xb7   :  { %p2499_p3 = pnand %p2498_p2, %p2492_p13 }
  0xb9   :  { %2502 = shalt.err (!%p2499_p3)
}
  0xba   :  { %146 = dma.hbm_to_vmem [thread:$0]  %s3146_s10, 16, %s144_s13, [#allocation21]  }
  0xbb   :  { %2525 = dma.done.wait [#allocation6], 1024  }
  0xbc   :  { %2526 = vsyncadd [#allocation6], 4294966272 }
  0xbd   :  { %2527 = dma.done.wait [#allocation9], 288  }
  0xbe   :  { %2528 = vsyncadd [#allocation9], 4294967008 }
  0xbf   :  { %2529 = dma.done.wait [#allocation12], 272  }
  0xc0   :  { %2530 = vsyncadd [#allocation12], 4294967024 }
  0xc1   :  { %2531 = dma.done.wait [#allocation15], 272  }
  0xc2   :  { %2532 = vsyncadd [#allocation15], 4294967024 }
  0xc3   :  { %2533 = dma.done.wait [#allocation18], 512  }
  0xc4   :  { %2534 = vsyncadd [#allocation18], 4294966784 }
  0xc5   :  { %2535 = dma.done.wait [#allocation21], 272  }
  0xc6   :  { %2536 = vsyncadd [#allocation21], 4294967024  ;;  %v2554_v0 = vmov 0.0   ;;  %vm2555_vm0 = vmmov 0   ;;  %vm220_vm1 = vcmask 1041408   ;;  %v2774_v3 = vld [vmem:[#allocation10] sm:$0xff]  }
  0xc7   :  { %1957 = vmatprep.subr.bf16.mxu1 %v2554_v0  ;;  %1961 = vmatprep.mubr.msk.bf16.mxu1 %vm2555_vm0, %v2554_v0  ;;  %v181_v1 = vld [vmem:[#allocation8] sm:$0x3]  ;;  %v190_v5 = vld [vmem:[#allocation5 + $0x8] sm:$0xff]  ;;  %vm207_vm2 = vcmask 31744   ;;  %v191_v7 = vld [vmem:[#allocation5 + $0x10] sm:$0xff]  ;;  %vm311_vm3 = vcmask 261120  }
  0xc8   :  { %2105 = vmatprep.subr.msk.bf16.mxu0 %vm220_vm1, %v181_v1  ;;  %v222_v2 = vsel %vm220_vm1, %v181_v1, 0  ;;  %v189_v4 = vld [vmem:[#allocation5] sm:$0xff]  ;;  %v192_v8 = vld [vmem:[#allocation5 + $0x18] sm:$0xff]  ;;  %1958 = vmatpush3.bf16.msra.mxu1 %v2774_v3  ;;  %v2777_v10 = vld [vmem:[#allocation10 + $0x8] sm:$0xff]   ;;  %s2556_s10 = smov 32  }
  0xc9   :  { %1948 = vmatpush3.bf16.msra.mxu0 %v222_v2  ;;  %v197_v6 = vpack.c.bf16 %v190_v5, %v189_v4  ;;  %v198_v9 = vpack.c.bf16 %v192_v8, %v191_v7  ;;  %v187_v11 = vld [vmem:[#allocation17] sm:$0xff]  ;;  %1959 = vmatprep.subr.bf16.mxu1 %v2554_v0  ;;  %v2796_v13 = vld [vmem:[#allocation11] ss:$0 sm:$0xff]  ;;  %v188_v25 = vld [vmem:[#allocation19] sm:$0xff] }
  0xca   :  { %1973 = vmatprep.subr.bf16.mxu0 %v2554_v0  ;;  %v298_v12 = vpack.c.bf16 %v187_v11, %v187_v11  ;;  %v193_v57 = vld [vmem:[#allocation5 + $0x20] sm:$0xff]  ;;  %v194_v58 = vld [vmem:[#allocation5 + $0x28] sm:$0xff]  ;;  %v195_v59 = vld [vmem:[#allocation5 + $0x30] sm:$0xff] }
  0xcb   :  { %1949 = vmatprep.mubr.msk.bf16.mxu0 %vm207_vm2, %v197_v6  ;;  %v199_v60 = vpack.c.bf16 %v194_v58, %v193_v57  ;;  %v196_v61 = vld [vmem:[#allocation5 + $0x38] sm:$0xff] }
  0xcc   :  { %1950 = vmatmul.mubr.msk.bf16.vlgmr.msra.gmra.mrb[0].mxu0 %vm207_vm2, %v198_v9  ;;  %1960 = vmatpush3.bf16.msra.mxu1 %v2777_v10  ;;  %v200_v62 = vpack.c.bf16 %v196_v61, %v195_v59 }
  0xcd   :  { %1974 = vmatpush3.bf16.msra.mxu0 %v2774_v3  ;;  %1965 = vmatprep.subr.bf16.mxu1 %v2554_v0 }
  0xce   :  { %1975 = vmatprep.subr.bf16.mxu0 %v2554_v0  ;;  %1953 = vmatprep.mubr.msk.bf16.mxu0 %vm207_vm2, %v199_v60 }
  0xcf   :  { %1962 = vmatmul.mubr.msk.bf16.vlgmr.msra.gmra.mrb[0].mxu1 %vm311_vm3, %v298_v12 }
  0xd0   :  { %1966 = vmatpush3.bf16.msra.mxu1 %v2774_v3  ;;  %1969 = vmatprep.mubr.msk.bf16.mxu1 %vm2555_vm0, %v2554_v0 }
  0xd1   :  { %1976 = vmatpush3.bf16.msra.mxu0 %v2777_v10  ;;  %1967 = vmatprep.subr.bf16.mxu1 %v2554_v0 }
  0xd2   :  { %1989 = vmatprep.subr.bf16.mxu0 %v2554_v0 }
  0xd4   :  { %1968 = vmatpush3.bf16.msra.mxu1 %v2777_v10  ;;  %1954 = vmatmul.mubr.msk.bf16.gmra.mrb[4].mxu0 %vm207_vm2, %v200_v62 }
  0xd5   :  { %1981 = vmatprep.subr.bf16.mxu1 %v2554_v0  ;;  %1977 = vmatprep.mubr.msk.bf16.mxu0 %vm2555_vm0, %v2554_v0 }
 0x19f   :  { %v2798_v14 = vpop.f32.mrb[0].mxu0 }
 0x1a0   :  { %v258_v15 = vpop.f32.mrb[1].mxu0  ;;  %v267_v11 = vadd.f32 %v2798_v14, %v2796_v13 }
 0x1a1   :  { %v259_v16 = vadd.f32 %v2796_v13, %v258_v15  ;;  %v2801_v17 = vpop.f32.mrb[2].mxu0 }
 0x1a2   :  { %v261_v18 = vpop.f32.mrb[3].mxu0  ;;  %v349_v19 = vpop.f32.mrb[0].mxu1 }
 0x1a3   :  { %v355_v20 = vadd.f32 %v349_v19, %v259_v16  ;;  %v1963_v21 = vpop.f32.mrb[1].mxu1  ;;  %v262_v41 = vadd.f32 %v2796_v13, %v261_v18 }
 0x1a4   :  { %v352_v22 = vpop.f32.mrb[2].mxu1 }
 0x1a5   :  { %v1964_v23 = vpop.f32.mrb[3].mxu1  ;;  %2133 = vtanh.f32 %v355_v20  ;;  %v1839_v26 = vmul.f32 -1.442695, %v355_v20 }
 0x1a7   :  { %2135 = vpow2.f32 %v1839_v26  ;;  %v2832_v5 = vpop.f32.mrb[4].mxu0 }
 0x1a8   :  { %v2834_v6 = vpop.f32.mrb[5].mxu0 }
 0x1a9   :  { %v2836_v7 = vpop.f32.mrb[6].mxu0 }
 0x1aa   :  { %v2838_v8 = vpop.f32.mrb[7].mxu0 }
 0x1af   :  { %v2134_v24 = vpop.eup %2133 }
 0x1b0   :  { %369 = vrot.lane.b32.xlu0 %v2134_v24, %s2542_s3 }
 0x1b1   :  { %v2136_v27 = vpop.eup %2135 }
 0x1b2   :  { %v359_v28 = vadd.f32 1.0, %v2136_v27 }
 0x1b4   :  { %364 = vrot.lane.b32.xlu0 %v188_v25, %s2556_s10  ;;  %2137 = vrcp.f32 %v359_v28 }
 0x1be   :  { %v2138_v29 = vpop.eup %2137 }
 0x222   :  { %v370_v30 = vpop.permute.xlu0 %369 }
 0x223   :  { %v372_v31 = vmul.f32 %v2138_v29, %v370_v30 }
 0x225   :  { %374 = vrot.lane.b32.xlu1 %v372_v31, %s2556_s10 }
 0x226   :  { %v365_v32 = vpop.permute.xlu0 %364 }
 0x227   :  { %v367_v33 = vmul.f32 %v2138_v29, %v365_v32 }
 0x297   :  { %v375_v34 = vpop.permute.xlu1 %374 }
 0x298   :  { %v377_v35 = vadd.f32 %v375_v34, %v367_v33  ;;  %v270_v34 = vadd.f32 %v2801_v17, %v2796_v13 }
 0x29a   :  { %2139 = vtanh.f32 %v377_v35 }
 0x2a4   :  { %v2140_v36 = vpop.eup %2139 }
 0x2a5   :  { %380 = vrot.lane.b32.xlu1 %v2140_v36, %s2542_s3 }
 0x317   :  { %v381_v37 = vpop.permute.xlu1 %380 }
 0x318   :  { %v2807_v38 = vmul.f32 %v2138_v29, %v381_v37 }
 0x31a   :  { %v391_v39 = vpack.c.bf16 %v2807_v38, %v2807_v38 }
 0x31c   :  { %393 = vrot.lane.b32.xlu0 %v391_v39, %s2556_s10 }
 0x38e   :  { %v394_v40 = vpop.permute.xlu0 %393 }
 0x38f   :  { %1970 = vmatmul.mubr.msk.bf16.vlgmr.msra.gmra.mrb[4].mxu1 %vm311_vm3, %v394_v40 }
 0x390   :  { %1982 = vmatpush3.bf16.msra.mxu1 %v2774_v3  ;;  %1985 = vmatprep.mubr.msk.bf16.mxu1 %vm2555_vm0, %v2554_v0 }
 0x391   :  { %1983 = vmatprep.subr.bf16.mxu1 %v2554_v0 }
 0x394   :  { %1984 = vmatpush3.bf16.msra.mxu1 %v2777_v10 }
 0x395   :  { %1997 = vmatprep.subr.bf16.mxu1 %v2554_v0 }
 0x462   :  { %v432_v42 = vpop.f32.mrb[4].mxu1 }
 0x463   :  { %v438_v43 = vadd.f32 %v432_v42, %v262_v41  ;;  %v1971_v44 = vpop.f32.mrb[5].mxu1 }
 0x464   :  { %v435_v45 = vpop.f32.mrb[6].mxu1 }
 0x465   :  { %2141 = vtanh.f32 %v438_v43  ;;  %v1972_v46 = vpop.f32.mrb[7].mxu1  ;;  %v1841_v48 = vmul.f32 -1.442695, %v438_v43 }
 0x467   :  { %2143 = vpow2.f32 %v1841_v48 }
 0x46f   :  { %v2142_v47 = vpop.eup %2141 }
 0x470   :  { %448 = vrot.lane.b32.xlu1 %v2142_v47, %s2542_s3 }
 0x471   :  { %v2144_v49 = vpop.eup %2143 }
 0x472   :  { %v442_v50 = vadd.f32 1.0, %v2144_v49 }
 0x474   :  { %2145 = vrcp.f32 %v442_v50 }
 0x47e   :  { %v2146_v51 = vpop.eup %2145 }
 0x47f   :  { %v446_v54 = vmul.f32 %v2146_v51, %v377_v35 }
 0x4e2   :  { %v449_v52 = vpop.permute.xlu1 %448 }
 0x4e3   :  { %v451_v53 = vmul.f32 %v2146_v51, %v449_v52 }
 0x4e5   :  { %453 = vrot.lane.b32.xlu0 %v451_v53, %s2556_s10 }
 0x557   :  { %v454_v55 = vpop.permute.xlu0 %453 }
 0x558   :  { %v456_v56 = vadd.f32 %v454_v55, %v446_v54  ;;  %v275_v55 = vadd.f32 %v2796_v13, %v2834_v6 }
 0x55a   :  { %2147 = vtanh.f32 %v456_v56 }
 0x564   :  { %v2148_v63 = vpop.eup %2147 }
 0x565   :  { %459 = vrot.lane.b32.xlu1 %v2148_v63, %s2542_s3 }
 0x5d7   :  { %v460_v1 = vpop.permute.xlu1 %459 }
 0x5d8   :  { %v2827_v2 = vmul.f32 %v2146_v51, %v460_v1 }
 0x5da   :  { %v471_v4 = vpack.c.bf16 %v2827_v2, %v2827_v2 }
 0x5dc   :  { %473 = vrot.lane.b32.xlu0 %v471_v4, %s2556_s10 }
 0x64e   :  { %v474_v9 = vpop.permute.xlu0 %473 }
 0x64f   :  { %1978 = vmatmul.mubr.msk.bf16.vlgmr.msra.gmra.mrb[8].mxu0 %vm311_vm3, %v474_v9 }
 0x650   :  { %1990 = vmatpush3.bf16.msra.mxu0 %v2774_v3  ;;  %1993 = vmatprep.mubr.msk.bf16.mxu0 %vm2555_vm0, %v2554_v0 }
 0x651   :  { %1991 = vmatprep.subr.bf16.mxu0 %v2554_v0 }
 0x654   :  { %1992 = vmatpush3.bf16.msra.mxu0 %v2777_v10 }
 0x655   :  { %2005 = vmatprep.subr.bf16.mxu0 %v2554_v0 }
 0x722   :  { %v512_v12 = vpop.f32.mrb[8].mxu0 }
 0x723   :  { %v518_v15 = vadd.f32 %v512_v12, %v267_v11  ;;  %v1979_v16 = vpop.f32.mrb[9].mxu0 }
 0x724   :  { %v515_v18 = vpop.f32.mrb[10].mxu0 }
 0x725   :  { %2149 = vtanh.f32 %v518_v15  ;;  %v1980_v19 = vpop.f32.mrb[11].mxu0  ;;  %v1843_v21 = vmul.f32 -1.442695, %v518_v15 }
 0x727   :  { %2151 = vpow2.f32 %v1843_v21 }
 0x72f   :  { %v2150_v20 = vpop.eup %2149 }
 0x730   :  { %528 = vrot.lane.b32.xlu1 %v2150_v20, %s2542_s3 }
 0x731   :  { %v2152_v22 = vpop.eup %2151 }
 0x732   :  { %v522_v23 = vadd.f32 1.0, %v2152_v22  ;;  %v278_v22 = vadd.f32 %v2796_v13, %v2838_v8 }
 0x734   :  { %2153 = vrcp.f32 %v522_v23 }
 0x73e   :  { %v2154_v24 = vpop.eup %2153 }
 0x73f   :  { %v526_v14 = vmul.f32 %v2154_v24, %v456_v56 }
 0x7a2   :  { %v529_v25 = vpop.permute.xlu1 %528 }
 0x7a3   :  { %v531_v26 = vmul.f32 %v2154_v24, %v529_v25 }
 0x7a5   :  { %533 = vrot.lane.b32.xlu0 %v531_v26, %s2556_s10 }
 0x817   :  { %v534_v27 = vpop.permute.xlu0 %533 }
 0x818   :  { %v536_v28 = vadd.f32 %v534_v27, %v526_v14 }
 0x81a   :  { %2155 = vtanh.f32 %v536_v28 }
 0x824   :  { %v2156_v29 = vpop.eup %2155 }
 0x825   :  { %539 = vrot.lane.b32.xlu1 %v2156_v29, %s2542_s3 }
 0x897   :  { %v540_v30 = vpop.permute.xlu1 %539 }
 0x898   :  { %v2852_v31 = vmul.f32 %v2154_v24, %v540_v30 }
 0x89a   :  { %v551_v32 = vpack.c.bf16 %v2852_v31, %v2852_v31 }
 0x89c   :  { %553 = vrot.lane.b32.xlu0 %v551_v32, %s2556_s10 }
 0x90e   :  { %v554_v33 = vpop.permute.xlu0 %553 }
 0x90f   :  { %1986 = vmatmul.mubr.msk.bf16.vlgmr.msra.gmra.mrb[8].mxu1 %vm311_vm3, %v554_v33 }
 0x910   :  { %1998 = vmatpush3.bf16.msra.mxu1 %v2774_v3  ;;  %2001 = vmatprep.mubr.msk.bf16.mxu1 %vm2555_vm0, %v2554_v0 }
 0x911   :  { %1999 = vmatprep.subr.bf16.mxu1 %v2554_v0 }
 0x914   :  { %2000 = vmatpush3.bf16.msra.mxu1 %v2777_v10 }
 0x915   :  { %2013 = vmatprep.subr.bf16.mxu1 %v2554_v0 }
 0x9e2   :  { %v592_v35 = vpop.f32.mrb[8].mxu1 }
 0x9e3   :  { %v598_v36 = vadd.f32 %v592_v35, %v270_v34  ;;  %v1987_v37 = vpop.f32.mrb[9].mxu1 }
 0x9e4   :  { %v595_v39 = vpop.f32.mrb[10].mxu1 }
 0x9e5   :  { %2157 = vtanh.f32 %v598_v36  ;;  %v1988_v40 = vpop.f32.mrb[11].mxu1  ;;  %v1845_v42 = vmul.f32 -1.442695, %v598_v36 }
 0x9e7   :  { %2159 = vpow2.f32 %v1845_v42 }
 0x9ef   :  { %v2158_v41 = vpop.eup %2157 }
 0x9f0   :  { %608 = vrot.lane.b32.xlu1 %v2158_v41, %s2542_s3  ;;  %v283_v41 = vadd.f32 %v2832_v5, %v2796_v13 }
 0x9f1   :  { %v2160_v43 = vpop.eup %2159 }
 0x9f2   :  { %v602_v44 = vadd.f32 1.0, %v2160_v43 }
 0x9f4   :  { %2161 = vrcp.f32 %v602_v44 }
 0x9fe   :  { %v2162_v45 = vpop.eup %2161 }
 0x9ff   :  { %v606_v17 = vmul.f32 %v2162_v45, %v536_v28 }
 0xa62   :  { %v609_v46 = vpop.permute.xlu1 %608 }
 0xa63   :  { %v611_v47 = vmul.f32 %v2162_v45, %v609_v46 }
 0xa65   :  { %613 = vrot.lane.b32.xlu0 %v611_v47, %s2556_s10 }
 0xad7   :  { %v614_v48 = vpop.permute.xlu0 %613 }
 0xad8   :  { %v616_v49 = vadd.f32 %v614_v48, %v606_v17 }
 0xada   :  { %2163 = vtanh.f32 %v616_v49 }
 0xae4   :  { %v2164_v50 = vpop.eup %2163 }
 0xae5   :  { %619 = vrot.lane.b32.xlu1 %v2164_v50, %s2542_s3 }
 0xb57   :  { %v620_v51 = vpop.permute.xlu1 %619 }
 0xb58   :  { %v2869_v52 = vmul.f32 %v2162_v45, %v620_v51 }
 0xb5a   :  { %v631_v53 = vpack.c.bf16 %v2869_v52, %v2869_v52 }
 0xb5c   :  { %633 = vrot.lane.b32.xlu0 %v631_v53, %s2556_s10 }
 0xbce   :  { %v634_v54 = vpop.permute.xlu0 %633 }
 0xbcf   :  { %1994 = vmatmul.mubr.msk.bf16.vlgmr.msra.gmra.mrb[12].mxu0 %vm311_vm3, %v634_v54 }
 0xbd0   :  { %2006 = vmatpush3.bf16.msra.mxu0 %v2774_v3  ;;  %2009 = vmatprep.mubr.msk.bf16.mxu0 %vm2555_vm0, %v2554_v0 }
 0xbd1   :  { %2007 = vmatprep.subr.bf16.mxu0 %v2554_v0 }
 0xbd4   :  { %2008 = vmatpush3.bf16.msra.mxu0 %v2777_v10 }
 0xca2   :  { %v672_v56 = vpop.f32.mrb[12].mxu0 }
 0xca3   :  { %v678_v57 = vadd.f32 %v672_v56, %v275_v55  ;;  %v1995_v58 = vpop.f32.mrb[13].mxu0 }
 0xca4   :  { %v675_v59 = vpop.f32.mrb[14].mxu0  ;;  %v2127_v58 = vld [vmem:[#allocation13] sm:$0xff]  }
 0xca5   :  { %2165 = vtanh.f32 %v678_v57  ;;  %v1996_v60 = vpop.f32.mrb[15].mxu0  ;;  %v1847_v62 = vmul.f32 -1.442695, %v678_v57  ;;  %v2128_v59 = vld [vmem:[#allocation13 + $0x8] sm:$0xff]   ;;  %2021 = vmatprep.subr.bf16.mxu0 %v2127_v58 }
 0xca7   :  { %2167 = vpow2.f32 %v1847_v62 }
 0xcaf   :  { %v2166_v61 = vpop.eup %2165 }
 0xcb0   :  { %688 = vrot.lane.b32.xlu1 %v2166_v61, %s2542_s3 }
 0xcb1   :  { %v2168_v63 = vpop.eup %2167 }
 0xcb2   :  { %v682_v1 = vadd.f32 1.0, %v2168_v63 }
 0xcb4   :  { %2169 = vrcp.f32 %v682_v1 }
 0xcbe   :  { %v2170_v4 = vpop.eup %2169 }
 0xcbf   :  { %v686_v6 = vmul.f32 %v2170_v4, %v616_v49 }
 0xd22   :  { %v689_v9 = vpop.permute.xlu1 %688 }
 0xd23   :  { %v691_v11 = vmul.f32 %v2170_v4, %v689_v9 }
 0xd25   :  { %693 = vrot.lane.b32.xlu0 %v691_v11, %s2556_s10 }
 0xd97   :  { %v694_v12 = vpop.permute.xlu0 %693 }
 0xd98   :  { %v696_v15 = vadd.f32 %v694_v12, %v686_v6  ;;  %v2935_v6 = vld [vmem:[#allocation14] sm:$0xff]   ;;  %v2940_v12 = vld [vmem:[#allocation14 + $0x8] sm:$0xff]  }
 0xd9a   :  { %2171 = vtanh.f32 %v696_v15 }
 0xda4   :  { %v2172_v16 = vpop.eup %2171 }
 0xda5   :  { %699 = vrot.lane.b32.xlu1 %v2172_v16, %s2542_s3 }
 0xe17   :  { %v700_v18 = vpop.permute.xlu1 %699 }
 0xe18   :  { %v2885_v19 = vmul.f32 %v2170_v4, %v700_v18  ;;  %v959_v18 = vld [vmem:[#allocation17 + $0x8] sm:$0xff] }
 0xe1a   :  { %v711_v20 = vpack.c.bf16 %v2885_v19, %v2885_v19 }
 0xe1c   :  { %713 = vrot.lane.b32.xlu0 %v711_v20, %s2556_s10  ;;  %v1078_v20 = vpack.c.bf16 %v959_v18, %v959_v18 }
 0xe8e   :  { %v714_v21 = vpop.permute.xlu0 %713 }
 0xe8f   :  { %2002 = vmatmul.mubr.msk.bf16.vlgmr.msra.gmra.mrb[12].mxu1 %vm311_vm3, %v714_v21 }
 0xe90   :  { %2014 = vmatpush3.bf16.msra.mxu1 %v2774_v3  ;;  %2017 = vmatprep.mubr.msk.bf16.mxu1 %vm2555_vm0, %v2554_v0 }
 0xe91   :  { %2015 = vmatprep.subr.bf16.mxu1 %v2554_v0 }
 0xe94   :  { %2016 = vmatpush3.bf16.msra.mxu1 %v2777_v10 }
 0xe95   :  { %2033 = vmatprep.subr.bf16.mxu1 %v2554_v0 }
 0xf62   :  { %v752_v23 = vpop.f32.mrb[12].mxu1 }
 0xf63   :  { %v758_v24 = vadd.f32 %v752_v23, %v278_v22  ;;  %v2003_v25 = vpop.f32.mrb[13].mxu1 }
 0xf64   :  { %v755_v26 = vpop.f32.mrb[14].mxu1  ;;  %v286_v25 = vadd.f32 %v2836_v7, %v2796_v13 }
 0xf65   :  { %2173 = vtanh.f32 %v758_v24  ;;  %v2004_v14 = vpop.f32.mrb[15].mxu1  ;;  %v1849_v3 = vmul.f32 -1.442695, %v758_v24 }
 0xf67   :  { %2175 = vpow2.f32 %v1849_v3 }
 0xf6f   :  { %v2174_v27 = vpop.eup %2173 }
 0xf70   :  { %768 = vrot.lane.b32.xlu1 %v2174_v27, %s2542_s3 }
 0xf71   :  { %v2176_v28 = vpop.eup %2175 }
 0xf72   :  { %v762_v29 = vadd.f32 1.0, %v2176_v28 }
 0xf74   :  { %2177 = vrcp.f32 %v762_v29  ;;  %v2967_v29 = vld [vmem:[#allocation16] ss:$0 sm:$0xff] }
 0xf7e   :  { %v2178_v10 = vpop.eup %2177 }
 0xf7f   :  { %v766_v8 = vmul.f32 %v2178_v10, %v696_v15  ;;  %v961_v15 = vld [vmem:[#allocation19 + $0x8] sm:$0xff] }
 0xfe2   :  { %v769_v30 = vpop.permute.xlu1 %768 }
 0xfe3   :  { %v771_v32 = vmul.f32 %v2178_v10, %v769_v30 }
 0xfe5   :  { %773 = vrot.lane.b32.xlu0 %v771_v32, %s2556_s10 }
0x1057   :  { %v774_v33 = vpop.permute.xlu0 %773 }
0x1058   :  { %v776_v34 = vadd.f32 %v774_v33, %v766_v8 }
0x105a   :  { %2179 = vtanh.f32 %v776_v34 }
0x1064   :  { %v2180_v35 = vpop.eup %2179 }
0x1065   :  { %779 = vrot.lane.b32.xlu1 %v2180_v35, %s2542_s3 }
0x10d7   :  { %v780_v36 = vpop.permute.xlu1 %779 }
0x10d8   :  { %v2902_v37 = vmul.f32 %v2178_v10, %v780_v36 }
0x10da   :  { %v791_v39 = vpack.c.bf16 %v2902_v37, %v2902_v37 }
0x10dc   :  { %793 = vrot.lane.b32.xlu0 %v791_v39, %s2556_s10 }
0x114e   :  { %v794_v40 = vpop.permute.xlu0 %793 }
0x114f   :  { %2010 = vmatmul.mubr.msk.bf16.vlgmr.msra.gmra.mrb[16].mxu0 %vm311_vm3, %v794_v40 }
0x1150   :  { %2022 = vmatpush3.bf16.msra.mxu0 %v2127_v58 }
0x1151   :  { %2023 = vmatprep.subr.bf16.mxu0 %v2128_v59 }
0x1154   :  { %2024 = vmatpush3.bf16.msra.mxu0 %v2128_v59 }
0x1155   :  { %2049 = vmatprep.subr.bf16.mxu0 %v2554_v0 }
0x1222   :  { %v832_v42 = vpop.f32.mrb[16].mxu0 }
0x1223   :  { %v838_v43 = vadd.f32 %v832_v42, %v283_v41  ;;  %v2011_v44 = vpop.f32.mrb[17].mxu0 }
0x1224   :  { %v835_v45 = vpop.f32.mrb[18].mxu0 }
0x1225   :  { %2181 = vtanh.f32 %v838_v43  ;;  %v2012_v46 = vpop.f32.mrb[19].mxu0  ;;  %v1851_v17 = vmul.f32 -1.442695, %v838_v43 }
0x1227   :  { %2183 = vpow2.f32 %v1851_v17 }
0x122f   :  { %v2182_v47 = vpop.eup %2181 }
0x1230   :  { %848 = vrot.lane.b32.xlu1 %v2182_v47, %s2542_s3 }
0x1231   :  { %v2184_v48 = vpop.eup %2183 }
0x1232   :  { %v842_v49 = vadd.f32 1.0, %v2184_v48 }
0x1234   :  { %2185 = vrcp.f32 %v842_v49 }
0x123e   :  { %v2186_v50 = vpop.eup %2185 }
0x123f   :  { %v846_v5 = vmul.f32 %v2186_v50, %v776_v34 }
0x12a2   :  { %v849_v51 = vpop.permute.xlu1 %848 }
0x12a3   :  { %v851_v53 = vmul.f32 %v2186_v50, %v849_v51 }
0x12a5   :  { %853 = vrot.lane.b32.xlu0 %v851_v53, %s2556_s10 }
0x12a9   :  { %385 = vrot.lane.b32.xlu0 %v2807_v38, %s2556_s10 }
0x12ad   :  { %544 = vrot.lane.b32.xlu0 %v2852_v31, %s2556_s10 }
0x1317   :  { %v854_v54 = vpop.permute.xlu0 %853 }
0x1318   :  { %v2916_v55 = vadd.f32 %v854_v54, %v846_v5 }
0x131a   :  { %2187 = vtanh.f32 %v2916_v55 }
0x131b   :  { %v386_v56 = vpop.permute.xlu0 %385 }
0x131c   :  { %388 = vst.msk [vmem:[#allocation2] sm:$0xff] %vm311_vm3, %v386_v56 }
0x131f   :  { %v545_v57 = vpop.permute.xlu0 %544 }
0x1320   :  { %548 = vst.msk [vmem:[#allocation2 + $0x10] sm:$0xff] %vm311_vm3, %v545_v57 }
0x1323   :  { %v962_v1 = vld [vmem:[#allocation2] sm:$0xff] }
0x1324   :  { %v2188_v38 = vpop.eup %2187 }
0x1325   :  { %859 = vrot.lane.b32.xlu1 %v2188_v38, %s2542_s3 }
0x1329   :  { %464 = vrot.lane.b32.xlu1 %v2827_v2, %s2556_s10 }
0x132d   :  { %624 = vrot.lane.b32.xlu1 %v2869_v52, %s2556_s10  ;;  %v964_v52 = vld [vmem:[#allocation2 + $0x10] sm:$0xff] }
0x1397   :  { %v860_v31 = vpop.permute.xlu1 %859 }
0x1398   :  { %v2927_v60 = vmul.f32 %v2186_v50, %v860_v31 }
0x139a   :  { %v871_v61 = vpack.c.bf16 %v2927_v60, %v2927_v60 }
0x139b   :  { %v465_v62 = vpop.permute.xlu1 %464 }
0x139c   :  { %468 = vst.msk [vmem:[#allocation2 + $0x8] sm:$0xff] %vm311_vm3, %v465_v62  ;;  %873 = vrot.lane.b32.xlu0 %v871_v61, %s2556_s10 }
0x139f   :  { %v625_v63 = vpop.permute.xlu1 %624 }
0x13a0   :  { %628 = vst.msk [vmem:[#allocation2 + $0x18] sm:$0xff] %vm311_vm3, %v625_v63  ;;  %1143 = vrot.lane.b32.xlu0 %v961_v15, %s2556_s10 }
0x13a3   :  { %v963_v4 = vld [vmem:[#allocation2 + $0x8] sm:$0xff] }
0x13a4   :  { %v970_v2 = vpack.c.bf16 %v963_v4, %v962_v1 }
0x13a6   :  { %2025 = vmatprep.mubr.msk.bf16.mxu0 %vm311_vm3, %v970_v2 }
0x13a7   :  { %v965_v9 = vld [vmem:[#allocation2 + $0x18] sm:$0xff] }
0x13a8   :  { %v971_v11 = vpack.c.bf16 %v965_v9, %v964_v52 }
0x13aa   :  { %2026 = vmatmul.mubr.msk.bf16.vlgmr.msra.gmra.mrb[20].mxu0 %vm311_vm3, %v971_v11 }
0x13ab   :  { %2050 = vmatpush3.bf16.msra.mxu0 %v2935_v6 }
0x13ac   :  { %2051 = vmatprep.subr.bf16.mxu0 %v2554_v0 }
0x13af   :  { %2052 = vmatpush3.bf16.msra.mxu0 %v2940_v12 }
0x13b0   :  { %2065 = vmatprep.subr.bf16.mxu0 %v2554_v0 }
0x140e   :  { %v874_v16 = vpop.permute.xlu0 %873 }
0x140f   :  { %2018 = vmatmul.mubr.msk.bf16.vlgmr.msra.gmra.mrb[16].mxu1 %vm311_vm3, %v874_v16 }
0x1410   :  { %2034 = vmatpush3.bf16.msra.mxu1 %v2935_v6  ;;  %2037 = vmatprep.mubr.msk.bf16.mxu1 %vm2555_vm0, %v2554_v0 }
0x1411   :  { %2035 = vmatprep.subr.bf16.mxu1 %v2554_v0 }
0x1412   :  { %v1144_v42 = vpop.permute.xlu0 %1143 }
0x1414   :  { %2036 = vmatpush3.bf16.msra.mxu1 %v2940_v12 }
0x1415   :  { %2041 = vmatprep.subr.bf16.mxu1 %v2554_v0 }
0x1417   :  { %2038 = vmatmul.mubr.msk.bf16.vlgmr.msra.gmra.mrb[20].mxu1 %vm311_vm3, %v1078_v20 }
0x1418   :  { %2042 = vmatpush3.bf16.msra.mxu1 %v2935_v6  ;;  %2045 = vmatprep.mubr.msk.bf16.mxu1 %vm2555_vm0, %v2554_v0 }
0x1419   :  { %2043 = vmatprep.subr.bf16.mxu1 %v2554_v0 }
0x141c   :  { %2044 = vmatpush3.bf16.msra.mxu1 %v2940_v12 }
0x141d   :  { %2057 = vmatprep.subr.bf16.mxu1 %v2554_v0 }
0x147d   :  { %v2959_v21 = vpop.f32.mrb[20].mxu0 }
0x147e   :  { %v1038_v22 = vpop.f32.mrb[21].mxu0 }
0x147f   :  { %v2961_v23 = vpop.f32.mrb[22].mxu0  ;;  %v1039_v10 = vadd.f32 %v2967_v29, %v1038_v22 }
0x1480   :  { %v2963_v24 = vpop.f32.mrb[23].mxu0 }
0x1481   :  { %v1042_v63 = vadd.f32 %v2967_v29, %v2963_v24 }
0x14e2   :  { %v912_v26 = vpop.f32.mrb[16].mxu1 }
0x14e3   :  { %v918_v14 = vadd.f32 %v912_v26, %v286_v25  ;;  %v2019_v27 = vpop.f32.mrb[17].mxu1 }
0x14e4   :  { %v915_v3 = vpop.f32.mrb[18].mxu1 }
0x14e5   :  { %v2020_v28 = vpop.f32.mrb[19].mxu1  ;;  %v1853_v17 = vmul.f32 -1.442695, %v918_v14 }
0x14ea   :  { %v1128_v30 = vpop.f32.mrb[20].mxu1 }
0x14eb   :  { %v1134_v32 = vadd.f32 %v1128_v30, %v1039_v10  ;;  %v2039_v8 = vpop.f32.mrb[21].mxu1 }
0x14ec   :  { %v1131_v33 = vpop.f32.mrb[22].mxu1 }
0x14ed   :  { %2189 = vtanh.f32 %v1134_v32  ;;  %v2040_v34 = vpop.f32.mrb[23].mxu1  ;;  %v1864_v36 = vmul.f32 -1.442695, %v1134_v32 }
0x14ef   :  { %2191 = vpow2.f32 %v1864_v36 }
0x14f7   :  { %v2190_v35 = vpop.eup %2189 }
0x14f8   :  { %1148 = vrot.lane.b32.xlu1 %v2190_v35, %s2542_s3 }
0x14f9   :  { %v2192_v13 = vpop.eup %2191 }
0x14fa   :  { %v1138_v7 = vadd.f32 1.0, %v2192_v13 }
0x14fc   :  { %2193 = vrcp.f32 %v1138_v7 }
0x1506   :  { %v2194_v39 = vpop.eup %2193 }
0x1507   :  { %v1146_v43 = vmul.f32 %v2194_v39, %v1144_v42 }
0x156a   :  { %v1149_v40 = vpop.permute.xlu1 %1148 }
0x156b   :  { %v1151_v41 = vmul.f32 %v2194_v39, %v1149_v40 }
0x156d   :  { %1153 = vrot.lane.b32.xlu1 %v1151_v41, %s2556_s10  ;;  %v1047_v41 = vadd.f32 %v2959_v21, %v2967_v29 }
0x15df   :  { %v1154_v44 = vpop.permute.xlu1 %1153 }
0x15e0   :  { %v1156_v45 = vadd.f32 %v1154_v44, %v1146_v43 }
0x15e2   :  { %2195 = vtanh.f32 %v1156_v45 }
0x15e3   :  { %2197 = vtanh.f32 %v918_v14 }
0x15e4   :  { %2199 = vpow2.f32 %v1853_v17 }
0x15ec   :  { %v2196_v46 = vpop.eup %2195 }
0x15ed   :  { %1159 = vrot.lane.b32.xlu0 %v2196_v46, %s2542_s3  ;;  %v2198_v47 = vpop.eup %2197 }
0x15ee   :  { %v2200_v48 = vpop.eup %2199 }
0x15ef   :  { %v922_v49 = vadd.f32 1.0, %v2200_v48 }
0x15f1   :  { %928 = vrot.lane.b32.xlu0 %v2198_v47, %s2542_s3  ;;  %2201 = vrcp.f32 %v922_v49 }
0x15fb   :  { %v2202_v5 = vpop.eup %2201 }
0x15fc   :  { %v926_v58 = vmul.f32 %v2202_v5, %v2916_v55 }
0x165f   :  { %v1160_v50 = vpop.permute.xlu0 %1159 }
0x1660   :  { %v2974_v51 = vmul.f32 %v2194_v39, %v1160_v50 }
0x1662   :  { %v1169_v53 = vpack.c.bf16 %v2974_v51, %v2974_v51 }
0x1663   :  { %v929_v54 = vpop.permute.xlu0 %928 }
0x1664   :  { %v931_v56 = vmul.f32 %v2202_v5, %v929_v54  ;;  %1171 = vrot.lane.b32.xlu1 %v1169_v53, %s2556_s10 }
0x1666   :  { %933 = vrot.lane.b32.xlu0 %v931_v56, %s2556_s10 }
0x16d6   :  { %v1172_v57 = vpop.permute.xlu1 %1171 }
0x16d7   :  { %2046 = vmatmul.mubr.msk.bf16.vlgmr.msra.gmra.mrb[24].mxu1 %vm311_vm3, %v1172_v57 }
0x16d8   :  { %v934_v59 = vpop.permute.xlu0 %933  ;;  %2058 = vmatpush3.bf16.msra.mxu1 %v2935_v6  ;;  %2061 = vmatprep.mubr.msk.bf16.mxu1 %vm2555_vm0, %v2554_v0 }
0x16d9   :  { %v936_v38 = vadd.f32 %v934_v59, %v926_v58  ;;  %2059 = vmatprep.subr.bf16.mxu1 %v2554_v0 }
0x16db   :  { %2203 = vtanh.f32 %v936_v38 }
0x16dc   :  { %2060 = vmatpush3.bf16.msra.mxu1 %v2940_v12 }
0x16dd   :  { %2073 = vmatprep.subr.bf16.mxu1 %v2554_v0 }
0x16e5   :  { %v2204_v31 = vpop.eup %2203 }
0x16e6   :  { %939 = vrot.lane.b32.xlu0 %v2204_v31, %s2542_s3 }
0x16ea   :  { %704 = vrot.lane.b32.xlu0 %v2885_v19, %s2556_s10 }
0x16ee   :  { %864 = vrot.lane.b32.xlu0 %v2927_v60, %s2556_s10 }
0x1758   :  { %v940_v55 = vpop.permute.xlu0 %939 }
0x1759   :  { %v942_v14 = vmul.f32 %v2202_v5, %v940_v55  ;;  %v1050_v55 = vadd.f32 %v2961_v23, %v2967_v29 }
0x175c   :  { %v705_v61 = vpop.permute.xlu0 %704 }
0x175d   :  { %708 = vst.msk [vmem:[#allocation2 + $0x20] sm:$0xff] %vm311_vm3, %v705_v61 }
0x1760   :  { %v865_v62 = vpop.permute.xlu0 %864 }
0x1761   :  { %868 = vst.msk [vmem:[#allocation2 + $0x30] sm:$0xff] %vm311_vm3, %v865_v62 }
0x1764   :  { %v966_v32 = vld [vmem:[#allocation2 + $0x20] sm:$0xff] }
0x1768   :  { %v968_v33 = vld [vmem:[#allocation2 + $0x30] sm:$0xff] }
0x17aa   :  { %v1210_v1 = vpop.f32.mrb[24].mxu1 }
0x17ab   :  { %v1216_v4 = vadd.f32 %v1210_v1, %v1042_v63  ;;  %v2047_v2 = vpop.f32.mrb[25].mxu1 }
0x17ac   :  { %v1213_v52 = vpop.f32.mrb[26].mxu1 }
0x17ad   :  { %2205 = vtanh.f32 %v1216_v4  ;;  %v2048_v9 = vpop.f32.mrb[27].mxu1  ;;  %v1866_v60 = vmul.f32 -1.442695, %v1216_v4 }
0x17af   :  { %2207 = vpow2.f32 %v1866_v60 }
0x17b7   :  { %v2206_v19 = vpop.eup %2205 }
0x17b8   :  { %1226 = vrot.lane.b32.xlu1 %v2206_v19, %s2542_s3 }
0x17b9   :  { %v2208_v11 = vpop.eup %2207 }
0x17ba   :  { %v1220_v15 = vadd.f32 1.0, %v2208_v11 }
0x17bc   :  { %2209 = vrcp.f32 %v1220_v15 }
0x17c6   :  { %v2210_v16 = vpop.eup %2209 }
0x17c7   :  { %v1224_v22 = vmul.f32 %v2210_v16, %v1156_v45 }
0x182a   :  { %v1227_v18 = vpop.permute.xlu1 %1226 }
0x182b   :  { %v1229_v20 = vmul.f32 %v2210_v16, %v1227_v18 }
0x182d   :  { %1231 = vrot.lane.b32.xlu1 %v1229_v20, %s2556_s10 }
0x189f   :  { %v1232_v24 = vpop.permute.xlu1 %1231 }
0x18a0   :  { %v1234_v25 = vadd.f32 %v1232_v24, %v1224_v22 }
0x18a2   :  { %2211 = vtanh.f32 %v1234_v25 }
0x18ac   :  { %v2212_v26 = vpop.eup %2211 }
0x18ad   :  { %1237 = vrot.lane.b32.xlu1 %v2212_v26, %s2542_s3 }
0x18b1   :  { %784 = vrot.lane.b32.xlu1 %v2902_v37, %s2556_s10 }
0x18b5   :  { %944 = vrot.lane.b32.xlu1 %v942_v14, %s2556_s10 }
0x191f   :  { %v1238_v27 = vpop.permute.xlu1 %1237 }
0x1920   :  { %v3003_v3 = vmul.f32 %v2210_v16, %v1238_v27 }
0x1922   :  { %v1248_v28 = vpack.c.bf16 %v3003_v3, %v3003_v3 }
0x1923   :  { %v785_v10 = vpop.permute.xlu1 %784 }
0x1924   :  { %788 = vst.msk [vmem:[#allocation2 + $0x28] sm:$0xff] %vm311_vm3, %v785_v10  ;;  %1250 = vrot.lane.b32.xlu0 %v1248_v28, %s2556_s10 }
0x1927   :  { %v945_v30 = vpop.permute.xlu1 %944 }
0x1928   :  { %948 = vst.msk [vmem:[#allocation2 + $0x38] sm:$0xff] %vm311_vm3, %v945_v30 }
0x192b   :  { %v967_v8 = vld [vmem:[#allocation2 + $0x28] sm:$0xff] }
0x192c   :  { %v972_v37 = vpack.c.bf16 %v967_v8, %v966_v32 }
0x192e   :  { %2029 = vmatprep.mubr.msk.bf16.mxu0 %vm311_vm3, %v972_v37 }
0x192f   :  { %v969_v34 = vld [vmem:[#allocation2 + $0x38] sm:$0xff] }
0x1930   :  { %v973_v35 = vpack.c.bf16 %v969_v34, %v968_v33 }
0x1932   :  { %2030 = vmatmul.mubr.msk.bf16.gmra.mrb[24].mxu0 %vm311_vm3, %v973_v35 }
0x1933   :  { %2053 = vmatprep.mubr.msk.bf16.mxu0 %vm2555_vm0, %v2554_v0 }
0x1996   :  { %v1251_v36 = vpop.permute.xlu0 %1250 }
0x1997   :  { %2054 = vmatmul.mubr.msk.bf16.vlgmr.msra.gmra.mrb[28].mxu0 %vm311_vm3, %v1251_v36 }
0x1998   :  { %2066 = vmatpush3.bf16.msra.mxu0 %v2935_v6  ;;  %2069 = vmatprep.mubr.msk.bf16.mxu0 %vm2555_vm0, %v2554_v0 }
0x1999   :  { %2067 = vmatprep.subr.bf16.mxu0 %v2554_v0 }
0x199c   :  { %2068 = vmatpush3.bf16.msra.mxu0 %v2940_v12 }
0x199d   :  { %2081 = vmatprep.subr.bf16.mxu0 %v2554_v0 }
0x1a05   :  { %v3021_v13 = vpop.f32.mrb[24].mxu0 }
0x1a06   :  { %v3023_v7 = vpop.f32.mrb[25].mxu0 }
0x1a07   :  { %v3025_v39 = vpop.f32.mrb[26].mxu0  ;;  %v1055_v14 = vadd.f32 %v2967_v29, %v3023_v7 }
0x1a08   :  { %v3027_v40 = vpop.f32.mrb[27].mxu0 }
0x1a6a   :  { %v1289_v42 = vpop.f32.mrb[28].mxu0 }
0x1a6b   :  { %v1295_v43 = vadd.f32 %v1289_v42, %v1047_v41  ;;  %v2055_v44 = vpop.f32.mrb[29].mxu0 }
0x1a6c   :  { %v1292_v45 = vpop.f32.mrb[30].mxu0 }
0x1a6d   :  { %2213 = vtanh.f32 %v1295_v43  ;;  %v2056_v46 = vpop.f32.mrb[31].mxu0  ;;  %v1868_v17 = vmul.f32 -1.442695, %v1295_v43 }
0x1a6f   :  { %2215 = vpow2.f32 %v1868_v17 }
0x1a77   :  { %v2214_v47 = vpop.eup %2213 }
0x1a78   :  { %1305 = vrot.lane.b32.xlu1 %v2214_v47, %s2542_s3 }
0x1a79   :  { %v2216_v48 = vpop.eup %2215 }
0x1a7a   :  { %v1299_v49 = vadd.f32 1.0, %v2216_v48  ;;  %v1058_v48 = vadd.f32 %v2967_v29, %v3027_v40 }
0x1a7c   :  { %2217 = vrcp.f32 %v1299_v49 }
0x1a86   :  { %v2218_v50 = vpop.eup %2217 }
0x1a87   :  { %v1303_v21 = vmul.f32 %v2218_v50, %v1234_v25 }
0x1aea   :  { %v1306_v53 = vpop.permute.xlu1 %1305 }
0x1aeb   :  { %v1308_v5 = vmul.f32 %v2218_v50, %v1306_v53 }
0x1aed   :  { %1310 = vrot.lane.b32.xlu0 %v1308_v5, %s2556_s10 }
0x1b5f   :  { %v1311_v54 = vpop.permute.xlu0 %1310 }
0x1b60   :  { %v1313_v56 = vadd.f32 %v1311_v54, %v1303_v21 }
0x1b62   :  { %2219 = vtanh.f32 %v1313_v56 }
0x1b6c   :  { %v2220_v57 = vpop.eup %2219 }
0x1b6d   :  { %1316 = vrot.lane.b32.xlu1 %v2220_v57, %s2542_s3 }
0x1bdf   :  { %v1317_v58 = vpop.permute.xlu1 %1316 }
0x1be0   :  { %v3034_v59 = vmul.f32 %v2218_v50, %v1317_v58 }
0x1be2   :  { %v1327_v38 = vpack.c.bf16 %v3034_v59, %v3034_v59 }
0x1be4   :  { %1329 = vrot.lane.b32.xlu0 %v1327_v38, %s2556_s10 }
0x1c56   :  { %v1330_v31 = vpop.permute.xlu0 %1329 }
0x1c57   :  { %2062 = vmatmul.mubr.msk.bf16.vlgmr.msra.gmra.mrb[28].mxu1 %vm311_vm3, %v1330_v31 }
0x1c58   :  { %2074 = vmatpush3.bf16.msra.mxu1 %v2935_v6  ;;  %2077 = vmatprep.mubr.msk.bf16.mxu1 %vm2555_vm0, %v2554_v0 }
0x1c59   :  { %2075 = vmatprep.subr.bf16.mxu1 %v2554_v0 }
0x1c5c   :  { %2076 = vmatpush3.bf16.msra.mxu1 %v2940_v12 }
0x1c5d   :  { %2089 = vmatprep.subr.bf16.mxu1 %v2554_v0 }
0x1d2a   :  { %v1368_v61 = vpop.f32.mrb[28].mxu1 }
0x1d2b   :  { %v1374_v62 = vadd.f32 %v1368_v61, %v1050_v55  ;;  %v2063_v63 = vpop.f32.mrb[29].mxu1 }
0x1d2c   :  { %v1371_v1 = vpop.f32.mrb[30].mxu1 }
0x1d2d   :  { %2221 = vtanh.f32 %v1374_v62  ;;  %v2064_v4 = vpop.f32.mrb[31].mxu1  ;;  %v1870_v52 = vmul.f32 -1.442695, %v1374_v62 }
0x1d2e   :  { %v1063_v4 = vadd.f32 %v3021_v13, %v2967_v29 }
0x1d2f   :  { %2223 = vpow2.f32 %v1870_v52 }
0x1d37   :  { %v2222_v2 = vpop.eup %2221 }
0x1d38   :  { %1384 = vrot.lane.b32.xlu1 %v2222_v2, %s2542_s3 }
0x1d39   :  { %v2224_v9 = vpop.eup %2223 }
0x1d3a   :  { %v1378_v19 = vadd.f32 1.0, %v2224_v9 }
0x1d3c   :  { %2225 = vrcp.f32 %v1378_v19 }
0x1d46   :  { %v2226_v60 = vpop.eup %2225 }
0x1d47   :  { %v1382_v23 = vmul.f32 %v2226_v60, %v1313_v56 }
0x1daa   :  { %v1385_v11 = vpop.permute.xlu1 %1384 }
0x1dab   :  { %v1387_v15 = vmul.f32 %v2226_v60, %v1385_v11 }
0x1dad   :  { %1389 = vrot.lane.b32.xlu0 %v1387_v15, %s2556_s10 }
0x1e1f   :  { %v1390_v16 = vpop.permute.xlu0 %1389 }
0x1e20   :  { %v1392_v18 = vadd.f32 %v1390_v16, %v1382_v23 }
0x1e22   :  { %2227 = vtanh.f32 %v1392_v18 }
0x1e2c   :  { %v2228_v20 = vpop.eup %2227 }
0x1e2d   :  { %1395 = vrot.lane.b32.xlu1 %v2228_v20, %s2542_s3 }
0x1e9f   :  { %v1396_v22 = vpop.permute.xlu1 %1395 }
0x1ea0   :  { %v3051_v24 = vmul.f32 %v2226_v60, %v1396_v22 }
0x1ea2   :  { %v1406_v25 = vpack.c.bf16 %v3051_v24, %v3051_v24 }
0x1ea4   :  { %1408 = vrot.lane.b32.xlu0 %v1406_v25, %s2556_s10 }
0x1f16   :  { %v1409_v26 = vpop.permute.xlu0 %1408 }
0x1f17   :  { %2070 = vmatmul.mubr.msk.bf16.vlgmr.msra.gmra.mrb[32].mxu0 %vm311_vm3, %v1409_v26 }
0x1f18   :  { %2082 = vmatpush3.bf16.msra.mxu0 %v2935_v6  ;;  %2085 = vmatprep.mubr.msk.bf16.mxu0 %vm2555_vm0, %v2554_v0 }
0x1f19   :  { %2083 = vmatprep.subr.bf16.mxu0 %v2554_v0 }
0x1f1c   :  { %2084 = vmatpush3.bf16.msra.mxu0 %v2940_v12 }
0x1fea   :  { %v1447_v27 = vpop.f32.mrb[32].mxu0 }
0x1feb   :  { %v1453_v28 = vadd.f32 %v1447_v27, %v1055_v14  ;;  %v2071_v10 = vpop.f32.mrb[33].mxu0 }
0x1fec   :  { %v1450_v30 = vpop.f32.mrb[34].mxu0 }
0x1fed   :  { %2229 = vtanh.f32 %v1453_v28  ;;  %v2072_v32 = vpop.f32.mrb[35].mxu0  ;;  %v1872_v37 = vmul.f32 -1.442695, %v1453_v28 }
0x1fee   :  { %v1066_v32 = vadd.f32 %v3025_v39, %v2967_v29 }
0x1fef   :  { %2231 = vpow2.f32 %v1872_v37 }
0x1ff7   :  { %v2230_v8 = vpop.eup %2229 }
0x1ff8   :  { %1463 = vrot.lane.b32.xlu1 %v2230_v8, %s2542_s3 }
0x1ff9   :  { %v2232_v33 = vpop.eup %2231 }
0x1ffa   :  { %v1457_v34 = vadd.f32 1.0, %v2232_v33 }
0x1ffc   :  { %2233 = vrcp.f32 %v1457_v34 }
0x2006   :  { %v2234_v35 = vpop.eup %2233 }
0x2007   :  { %v1461_v7 = vmul.f32 %v2234_v35, %v1392_v18 }
0x206a   :  { %v1464_v36 = vpop.permute.xlu1 %1463 }
0x206b   :  { %v1466_v41 = vmul.f32 %v2234_v35, %v1464_v36 }
0x206d   :  { %1468 = vrot.lane.b32.xlu0 %v1466_v41, %s2556_s10 }
0x20df   :  { %v1469_v42 = vpop.permute.xlu0 %1468 }
0x20e0   :  { %v1471_v43 = vadd.f32 %v1469_v42, %v1461_v7 }
0x20e2   :  { %2235 = vtanh.f32 %v1471_v43 }
0x20ec   :  { %v2236_v44 = vpop.eup %2235 }
0x20ed   :  { %1474 = vrot.lane.b32.xlu1 %v2236_v44, %s2542_s3 }
0x215f   :  { %v1475_v45 = vpop.permute.xlu1 %1474 }
0x2160   :  { %v3067_v46 = vmul.f32 %v2234_v35, %v1475_v45 }
0x2162   :  { %v1485_v47 = vpack.c.bf16 %v3067_v46, %v3067_v46 }
0x2164   :  { %1487 = vrot.lane.b32.xlu0 %v1485_v47, %s2556_s10 }
0x21d6   :  { %v1488_v17 = vpop.permute.xlu0 %1487 }
0x21d7   :  { %2078 = vmatmul.mubr.msk.bf16.vlgmr.msra.gmra.mrb[32].mxu1 %vm311_vm3, %v1488_v17 }
0x21d8   :  { %2090 = vmatpush3.bf16.msra.mxu1 %v2935_v6  ;;  %2093 = vmatprep.mubr.msk.bf16.mxu1 %vm2555_vm0, %v2554_v0 }
0x21d9   :  { %2091 = vmatprep.subr.bf16.mxu1 %v2554_v0 }
0x21dc   :  { %2092 = vmatpush3.bf16.msra.mxu1 %v2940_v12 }
0x22aa   :  { %v1526_v49 = vpop.f32.mrb[32].mxu1 }
0x22ab   :  { %v1532_v50 = vadd.f32 %v1526_v49, %v1058_v48  ;;  %v2079_v53 = vpop.f32.mrb[33].mxu1 }
0x22ac   :  { %v1529_v5 = vpop.f32.mrb[34].mxu1 }
0x22ad   :  { %2237 = vtanh.f32 %v1532_v50  ;;  %v2080_v21 = vpop.f32.mrb[35].mxu1  ;;  %v1874_v6 = vmul.f32 -1.442695, %v1532_v50 }
0x22af   :  { %2239 = vpow2.f32 %v1874_v6 }
0x22b7   :  { %v2238_v54 = vpop.eup %2237 }
0x22b8   :  { %1542 = vrot.lane.b32.xlu1 %v2238_v54, %s2542_s3 }
0x22b9   :  { %v2240_v56 = vpop.eup %2239 }
0x22ba   :  { %v1536_v57 = vadd.f32 1.0, %v2240_v56 }
0x22bc   :  { %2241 = vrcp.f32 %v1536_v57 }
0x22c6   :  { %v2242_v0 = vpop.eup %2241 }
0x22c7   :  { %v1540_v40 = vmul.f32 %v2242_v0, %v1471_v43 }
0x232a   :  { %v1543_v58 = vpop.permute.xlu1 %1542 }
0x232b   :  { %v1545_v12 = vmul.f32 %v2242_v0, %v1543_v58 }
0x232d   :  { %1547 = vrot.lane.b32.xlu0 %v1545_v12, %s2556_s10 }
0x239f   :  { %v1548_v38 = vpop.permute.xlu0 %1547 }
0x23a0   :  { %v1550_v31 = vadd.f32 %v1548_v38, %v1540_v40 }
0x23a2   :  { %2243 = vtanh.f32 %v1550_v31 }
0x23ac   :  { %v2244_v55 = vpop.eup %2243 }
0x23ad   :  { %1553 = vrot.lane.b32.xlu1 %v2244_v55, %s2542_s3 }
0x241f   :  { %v1554_v61 = vpop.permute.xlu1 %1553 }
0x2420   :  { %v3083_v62 = vmul.f32 %v2242_v0, %v1554_v61 }
0x2422   :  { %v1564_v63 = vpack.c.bf16 %v3083_v62, %v3083_v62 }
0x2424   :  { %1566 = vrot.lane.b32.xlu0 %v1564_v63, %s2556_s10 }
0x2496   :  { %v1567_v1 = vpop.permute.xlu0 %1566 }
0x2497   :  { %2086 = vmatmul.mubr.msk.bf16.vlgmr.msra.gmra.mrb[36].mxu0 %vm311_vm3, %v1567_v1 }
0x256a   :  { %v1605_v2 = vpop.f32.mrb[36].mxu0 }
0x256b   :  { %v1611_v52 = vadd.f32 %v1605_v2, %v1063_v4  ;;  %v2087_v9 = vpop.f32.mrb[37].mxu0 }
0x256c   :  { %v1608_v19 = vpop.f32.mrb[38].mxu0 }
0x256d   :  { %2245 = vtanh.f32 %v1611_v52  ;;  %v2088_v60 = vpop.f32.mrb[39].mxu0  ;;  %v1876_v15 = vmul.f32 -1.442695, %v1611_v52 }
0x256f   :  { %2247 = vpow2.f32 %v1876_v15 }
0x2577   :  { %v2246_v11 = vpop.eup %2245 }
0x2578   :  { %1621 = vrot.lane.b32.xlu1 %v2246_v11, %s2542_s3 }
0x2579   :  { %v2248_v23 = vpop.eup %2247 }
0x257a   :  { %v1615_v16 = vadd.f32 1.0, %v2248_v23 }
0x257c   :  { %2249 = vrcp.f32 %v1615_v16 }
0x2586   :  { %v2250_v18 = vpop.eup %2249 }
0x2587   :  { %v1619_v13 = vmul.f32 %v2250_v18, %v1550_v31  ;;  %v1879_v31 = vld [vmem:[#allocation22] ss:$0 sm:$0xff] }
0x25ea   :  { %v1622_v20 = vpop.permute.xlu1 %1621 }
0x25eb   :  { %v1624_v22 = vmul.f32 %v2250_v18, %v1622_v20 }
0x25ed   :  { %1626 = vrot.lane.b32.xlu0 %v1624_v22, %s2556_s10 }
0x265f   :  { %v1627_v25 = vpop.permute.xlu0 %1626 }
0x2660   :  { %v1629_v26 = vadd.f32 %v1627_v25, %v1619_v13 }
0x2662   :  { %2251 = vtanh.f32 %v1629_v26 }
0x266c   :  { %v2252_v14 = vpop.eup %2251 }
0x266d   :  { %1632 = vrot.lane.b32.xlu1 %v2252_v14, %s2542_s3 }
0x26df   :  { %v1633_v27 = vpop.permute.xlu1 %1632 }
0x26e0   :  { %v1635_v28 = vmul.f32 %v2250_v18, %v1633_v27 }
0x26e2   :  { %v1643_v10 = vpack.c.bf16 %v1635_v28, %v1635_v28 }
0x26e4   :  { %1645 = vrot.lane.b32.xlu0 %v1643_v10, %s2556_s10 }
0x2756   :  { %v1646_v30 = vpop.permute.xlu0 %1645 }
0x2757   :  { %2094 = vmatmul.mubr.msk.bf16.vlgmr.msra.gmra.mrb[36].mxu1 %vm311_vm3, %v1646_v30 }
0x282a   :  { %v1684_v8 = vpop.f32.mrb[36].mxu1 }
0x282b   :  { %v1690_v37 = vadd.f32 %v1684_v8, %v1066_v32  ;;  %v2095_v33 = vpop.f32.mrb[37].mxu1 }
0x282c   :  { %v1687_v34 = vpop.f32.mrb[38].mxu1 }
0x282d   :  { %2253 = vtanh.f32 %v1690_v37  ;;  %v2096_v35 = vpop.f32.mrb[39].mxu1  ;;  %v1878_v41 = vmul.f32 -1.442695, %v1690_v37 }
0x282f   :  { %2255 = vpow2.f32 %v1878_v41 }
0x2837   :  { %v2254_v36 = vpop.eup %2253 }
0x2838   :  { %1700 = vrot.lane.b32.xlu1 %v2254_v36, %s2542_s3 }
0x2839   :  { %v2256_v7 = vpop.eup %2255 }
0x283a   :  { %v1694_v42 = vadd.f32 1.0, %v2256_v7 }
0x283c   :  { %2257 = vrcp.f32 %v1694_v42 }
0x2846   :  { %v2258_v43 = vpop.eup %2257 }
0x2847   :  { %v1698_v29 = vmul.f32 %v2258_v43, %v1629_v26 }
0x28aa   :  { %v1701_v44 = vpop.permute.xlu1 %1700 }
0x28ab   :  { %v1703_v45 = vmul.f32 %v2258_v43, %v1701_v44 }
0x28ad   :  { %1705 = vrot.lane.b32.xlu0 %v1703_v45, %s2556_s10 }
0x28b1   :  { %1479 = vrot.lane.b32.xlu0 %v3067_v46, %s2556_s10 }
0x28b5   :  { %1637 = vrot.lane.b32.xlu0 %v1635_v28, %s2556_s10 }
0x28b9   :  { %1164 = vrot.lane.b32.xlu0 %v2974_v51, %s2556_s10  ;;  %v2131_v51 = vld [vmem:[#allocation20] sm:$0xff]  }
0x28ba   :  { %2097 = vmatprep.subr.bf16.mxu0 %v2131_v51 }
0x28bb   :  { %2098 = vmatpush3.bf16.msra.mxu0 %v2131_v51 }
0x28bd   :  { %1321 = vrot.lane.b32.xlu0 %v3034_v59, %s2556_s10  ;;  %v2132_v59 = vld [vmem:[#allocation20 + $0x8] sm:$0xff]  }
0x28be   :  { %2099 = vmatprep.subr.bf16.mxu0 %v2132_v59 }
0x28bf   :  { %2100 = vmatpush3.bf16.msra.mxu0 %v2132_v59 }
0x291f   :  { %v1706_v39 = vpop.permute.xlu0 %1705 }
0x2920   :  { %v1708_v47 = vadd.f32 %v1706_v39, %v1698_v29 }
0x2922   :  { %2259 = vtanh.f32 %v1708_v47 }
0x2923   :  { %v1480_v17 = vpop.permute.xlu0 %1479 }
0x2924   :  { %1483 = vst.msk [vmem:[#allocation3 + $0x20] sm:$0xff] %vm311_vm3, %v1480_v17 }
0x2927   :  { %v1638_v48 = vpop.permute.xlu0 %1637 }
0x2928   :  { %1641 = vst.msk [vmem:[#allocation3 + $0x30] sm:$0xff] %vm311_vm3, %v1638_v48 }
0x292b   :  { %v1165_v49 = vpop.permute.xlu0 %1164  ;;  %v1721_v54 = vld [vmem:[#allocation3 + $0x20] sm:$0xff] }
0x292c   :  { %v2260_v46 = vpop.eup %2259 }
0x292d   :  { %1711 = vrot.lane.b32.xlu1 %v2260_v46, %s2542_s3  ;;  %s2557_s3 = smov [#allocation23]  }
0x292e   :  { %s1814_s20 = sshll.u32 %s2557_s3, 4  ;;  %s1815_s20 = int_to_ptr.vmem [resolvable:$true] %s1814_s20 }
0x292f   :  { %v1322_v50 = vpop.permute.xlu0 %1321  ;;  %v1723_v12 = vld [vmem:[#allocation3 + $0x30] sm:$0xff]  ;;  %s2503_s5 = scalar_lea.vmem %s1815_s20, 512  ;;  %p2508_p5 = scmp.lt.s32.totalorder %s1815_s20, %s1815_s20 }
0x2930   :  { %p2504_p4 = scmp.ne.s32.totalorder %s1815_s20, %s2503_s5  ;;  %p2509_p6 = scmp.lt.s32.totalorder %s2503_s5, %s2503_s5 }
0x2931   :  { %1558 = vrot.lane.b32.xlu1 %v3083_v62, %s2556_s10 }
0x2932   :  { %p2510_p7 = por %p2509_p6, %p2508_p5 }
0x2934   :  { %p2511_p8 = pnand %p2510_p7, %p2504_p4 }
0x299f   :  { %v1712_v53 = vpop.permute.xlu1 %1711 }
0x29a0   :  { %v1714_v5 = vmul.f32 %v2258_v43, %v1712_v53 }
0x29a2   :  { %1716 = vrot.lane.b32.xlu1 %v1714_v5, %s2556_s10 }
0x29a3   :  { %v1559_v21 = vpop.permute.xlu1 %1558 }
0x29a4   :  { %1562 = vst.msk [vmem:[#allocation3 + $0x28] sm:$0xff] %vm311_vm3, %v1559_v21 }
0x29a6   :  { %1242 = vrot.lane.b32.xlu1 %v3003_v3, %s2556_s10 }
0x29aa   :  { %1400 = vrot.lane.b32.xlu1 %v3051_v24, %s2556_s10 }
0x29ab   :  { %v1722_v6 = vld [vmem:[#allocation3 + $0x28] sm:$0xff] }
0x29ac   :  { %v1725_v56 = vpack.c.bf16 %v1722_v6, %v1721_v54 }
0x29ae   :  { %2101 = vmatprep.mubr.msk.bf16.mxu0 %vm311_vm3, %v1725_v56 }
0x2a14   :  { %v1717_v57 = vpop.permute.xlu1 %1716 }
0x2a15   :  { %1720 = vst.msk [vmem:[#allocation3 + $0x38] sm:$0xff] %vm311_vm3, %v1717_v57 }
0x2a18   :  { %v1243_v0 = vpop.permute.xlu1 %1242 }
0x2a1c   :  { %v1401_v58 = vpop.permute.xlu1 %1400  ;;  %v1724_v40 = vld [vmem:[#allocation3 + $0x38] sm:$0xff] }
0x2a1d   :  { %v1726_v38 = vpack.c.bf16 %v1724_v40, %v1723_v12 }
0x2a1f   :  { %2102 = vmatmul.mubr.msk.bf16.vlgmr.msra.gmra.mrb[40].mxu0 %vm311_vm3, %v1726_v38 }
0x2af2   :  { %v2103_v3 = vpop.f32.mrb[40].mxu0 }
0x2af3   :  { %v1799_v55 = vadd.f32 %v2103_v3, %v1879_v31  ;;  %v1790_v61 = vpop.f32.mrb[41].mxu0 }
0x2af4   :  { %v1791_v24 = vadd.f32 %v1879_v31, %v1790_v61  ;;  %v2104_v62 = vpop.f32.mrb[42].mxu0 }
0x2af5   :  { %1807 = vst [vmem:[#allocation23 + $0x10] sm:$0xff] %v1799_v55  ;;  %v1802_v63 = vadd.f32 %v2104_v62, %v1879_v31  ;;  %v1793_v1 = vpop.f32.mrb[43].mxu0 }
0x2af6   :  { %1805 = vst [vmem:[#allocation23] sm:$0xff] %v1791_v24  ;;  %v1794_v4 = vadd.f32 %v1879_v31, %v1793_v1 }
0x2af7   :  { %1808 = vst [vmem:[#allocation23 + $0x18] sm:$0xff] %v1802_v63 }
0x2af8   :  { %1806 = vst [vmem:[#allocation23 + $0x8] sm:$0xff] %v1794_v4 }
0x2af9   :  { %2514 = shalt.err (!%p2511_p8)
}
0x2afa   :  { %s2515_s13 = scalar_lea.hbm %s3147_s11, 512 }
0x2afb   :  { %p2516_p9 = scmp.ne.s32.totalorder %s3147_s11, %s2515_s13  ;;  %p2519_p10 = scmp.lt.u32.totalorder %s2515_s13, %s3147_s11 }
0x2afd   :  { %p2521_p11 = pnand %p2519_p10, %p2516_p9 }
0x2aff   :  { %2524 = shalt.err (!%p2521_p11)
}
0x2b00   :  { %1820 = dma.vmem_to_hbm [thread:$0]  %s1815_s20, 512, %s3147_s11, [#allocation7], %s2546_s24, %s2546_s24, %s2547_s28  }
0x2b01   :  { %2537 = dma.done.wait [#allocation7], 512  }
0x2b02   :  { %2538 = vsyncadd [#allocation7], 4294966784 }
0x2b03   :  { %1824 = vsyncpa [#allocation6], 1 }
0x2b04   :  { %1825 = vsyncpa [#allocation9], 1 }
0x2b05   :  { %1826 = vsyncpa [#allocation12], 1 }
0x2b06   :  { %1827 = vsyncpa [#allocation15], 1 }
0x2b07   :  { %1828 = vsyncpa [#allocation18], 1 }
0x2b08   :  { %1829 = vsyncpa [#allocation21], 1 }
0x2b09   :  { %1830 = vsyncpa [#allocation7], 1 }

</bundles_post_ra>
